<compile_context>
chip_gen: v5e
topology: v5e:2x2
jax: 0.10.0
libtpu: 0.0.40
codegen_flags: <defaults>
</compile_context>

<pallas_src>
import math
from functools import partial

import numpy as np
import jax
import jax.numpy as jnp
from jax.experimental import pallas as pl
from jax.experimental.pallas import tpu as pltpu


# ----------------------------- fused decoder kernel -------------------------

def _make_decoder_kernel(*, n_heads, n_layers, d_k, has_cross, n_q, eps,
                         pe_scale, attn_scale, feat):
    bf16 = jnp.bfloat16

    def _norm(x, a, b):
        # Matches the custom `Norm`: alpha*(x-mean)/(std+eps)+bias, torch.std is UNBIASED.
        mean = jnp.mean(x, axis=-1, keepdims=True)
        diff = x - mean
        var = jnp.sum(diff * diff, axis=-1, keepdims=True) * (1.0 / (feat - 1.0))
        return a * (diff * pl.reciprocal(jnp.sqrt(var) + eps)) + b

    def _attn(q_in_b, kv_b, bias, wq, bq, wk, bk, wv, bv, wo, bo):
        # Projections: bf16 MXU inputs, f32 accumulation, f32 bias add.
        q = jnp.dot(q_in_b, wq, preferred_element_type=jnp.float32) + bq
        k = jnp.dot(kv_b, wk, preferred_element_type=jnp.float32) + bk
        v = jnp.dot(kv_b, wv, preferred_element_type=jnp.float32) + bv
        # Stack heads on the sublane axis: [rows, H] -> [n_heads*rows, d_k]
        # (row ordering: head-major, then (batch, position)).  One MXU pass for
        # all heads instead of n_heads tiny matmuls.
        qs = jnp.concatenate([q[:, h * d_k:(h + 1) * d_k] for h in range(n_heads)],
                             axis=0).astype(bf16)
        ks = jnp.concatenate([k[:, h * d_k:(h + 1) * d_k] for h in range(n_heads)],
                             axis=0).astype(bf16)
        vs = jnp.concatenate([v[:, h * d_k:(h + 1) * d_k] for h in range(n_heads)],
                             axis=0).astype(bf16)
        # All-head scores in one dot; `bias` is 0 for kept entries of the correct
        # (head, batch) diagonal block and -1e9 elsewhere, so the row softmax over
        # the stacked columns equals the per-head per-batch softmax exactly
        # (masked terms underflow to 0.0 in f32, same as the torch masked_fill).
        s = jax.lax.dot_general(qs, ks, (((1,), (1,)), ((), ())),
                                preferred_element_type=jnp.float32)
        s = s * attn_scale + bias
        s = s - jnp.max(s, axis=-1, keepdims=True)
        p = jnp.exp(s)
        p = p * pl.reciprocal(jnp.sum(p, axis=-1, keepdims=True), approx=True)
        o = jnp.dot(p.astype(bf16), vs, preferred_element_type=jnp.float32)
        # Un-stack heads back onto the lane axis == concat over heads.
        o = jnp.concatenate([o[h * n_q:(h + 1) * n_q, :] for h in range(n_heads)],
                            axis=1).astype(bf16)
        return jnp.dot(o, wo, preferred_element_type=jnp.float32) + bo

    def kernel(*refs):
        if has_cross:
            (x0_ref, pe_ref, sbias_ref, e_ref, cbias_ref,
             n1a, n1b, wq1, bq1, wk1, bk1, wv1, bv1, wo1, bo1,
             n2a, n2b, wq2, bq2, wk2, bk2, wv2, bv2, wo2, bo2,
             n3a, n3b, w1, b1, w2, b2, fa, fb,
             o_ref, x_sc) = refs
        else:
            (x0_ref, pe_ref, sbias_ref,
             n1a, n1b, wq1, bq1, wk1, bk1, wv1, bv1, wo1, bo1,
             n2a, n2b, w1, b1, w2, b2, fa, fb,
             o_ref, x_sc) = refs

        l = pl.program_id(0)

        # Step 0: positional encoding folded into the resident activation.
        @pl.when(l == 0)
        def _():
            x_sc[...] = x0_ref[...] * pe_scale + pe_ref[...]

        x = x_sc[...]                                   # [B*S, H] f32, VMEM-resident

        # --- self-attention sublayer ---
        x2b = _norm(x, n1a[0], n1b[0]).astype(bf16)
        x = x + _attn(x2b, x2b, sbias_ref[...],
                      wq1[0], bq1[0], wk1[0], bk1[0], wv1[0], bv1[0], wo1[0], bo1[0])

        # --- cross-attention sublayer (bi=True) ---
        if has_cross:
            x2b = _norm(x, n2a[0], n2b[0]).astype(bf16)
            x = x + _attn(x2b, e_ref[...], cbias_ref[...],
                          wq2[0], bq2[0], wk2[0], bk2[0], wv2[0], bv2[0],
                          wo2[0], bo2[0])
            ff_in = _norm(x, n3a[0], n3b[0])
        else:
            ff_in = _norm(x, n2a[0], n2b[0])

        # --- feed-forward sublayer ---
        h1 = jnp.dot(ff_in.astype(bf16), w1[0],
                     preferred_element_type=jnp.float32) + b1[0]
        h1 = jnp.maximum(h1, 0.0)
        x = x + jnp.dot(h1.astype(bf16), w2[0],
                        preferred_element_type=jnp.float32) + b2[0]

        x_sc[...] = x                                   # carry to the next layer step

        # Final Norm folded into the last grid step; output written once.
        @pl.when(l == n_layers - 1)
        def _():
            o_ref[...] = _norm(x, fa[...], fb[...])

    return kernel


# ----------------------------- wrapper ---------------------------------------

def _build_attn_bias(mask, n_heads):
    # mask: [B, Sq, Skv] with 1 = keep.  Returns additive bias for the stacked
    # (head-major) score matrix: 0 where (same head, same batch, mask keeps),
    # -1e9 everywhere else.
    Bm, Sq, Skv = mask.shape
    keep = mask > 0.5
    eb = jnp.eye(Bm, dtype=bool)
    eh = jnp.eye(n_heads, dtype=bool)
    big = (keep[None, :, :, None, None, :]
           & eb[None, :, None, None, :, None]
           & eh[:, None, None, :, None, None])          # [h, b, sq, h2, b2, sk]
    big = big.reshape(n_heads * Bm * Sq, n_heads * Bm * Skv)
    return jnp.where(big, 0.0, -1e9).astype(jnp.float32)


def decoder_forward(params, pe_table, trg, trg_mask, e_outputs=None, src_mask=None,
                    n_heads=4):
    # TODO(synk): nn.Dropout layers are identity here (eval-mode forward).
    B, S, H = trg.shape
    layers = params["layers"]
    L = len(layers)
    has_cross = e_outputs is not None
    BS = B * S
    d_k = H // n_heads
    bf16 = jnp.bfloat16

    x0 = trg.reshape(BS, H)
    pe_bs = jnp.broadcast_to(pe_table[:S][None], (B, S, H)).reshape(BS, H)
    self_bias = _build_attn_bias(trg_mask, n_heads)

    def stack(fn, dtype=None):
        a = jnp.stack([fn(p) for p in layers], axis=0)
        return a if dtype is None else a.astype(dtype)

    def lspec(arr):   # per-layer stacked operand: stream one layer slice per step
        blk = (1,) + arr.shape[1:]
        zeros = (0,) * (arr.ndim - 1)
        return pl.BlockSpec(blk, lambda l, _z=zeros: (l,) + _z)

    def fspec(arr):   # layer-invariant operand: single full block, resident
        zeros = (0,) * arr.ndim
        return pl.BlockSpec(arr.shape, lambda l, _z=zeros: _z)

    operands, in_specs = [], []

    def add_full(a):
        operands.append(a); in_specs.append(fspec(a))

    def add_layered(a):
        operands.append(a); in_specs.append(lspec(a))

    def add_attn(key):
        for nm in ("q", "k", "v", "o"):
            add_layered(stack(lambda p, k=key, n=nm: p[k]["w" + n], bf16))
            add_layered(stack(lambda p, k=key, n=nm: p[k]["b" + n].reshape(1, -1)))

    add_full(x0)
    add_full(pe_bs)
    add_full(self_bias)
    if has_cross:
        Skv = e_outputs.shape[1]
        add_full(e_outputs.reshape(B * Skv, H).astype(bf16))
        add_full(_build_attn_bias(src_mask, n_heads))

    add_layered(stack(lambda p: p["n1_a"].reshape(1, -1)))
    add_layered(stack(lambda p: p["n1_b"].reshape(1, -1)))
    add_attn("attn1")
    add_layered(stack(lambda p: p["n2_a"].reshape(1, -1)))
    add_layered(stack(lambda p: p["n2_b"].reshape(1, -1)))
    if has_cross:
        add_attn("attn2")
        add_layered(stack(lambda p: p["n3_a"].reshape(1, -1)))
        add_layered(stack(lambda p: p["n3_b"].reshape(1, -1)))
    add_layered(stack(lambda p: p["ff"]["w1"], bf16))
    add_layered(stack(lambda p: p["ff"]["b1"].reshape(1, -1)))
    add_layered(stack(lambda p: p["ff"]["w2"], bf16))
    add_layered(stack(lambda p: p["ff"]["b2"].reshape(1, -1)))
    add_full(params["final"]["a"].reshape(1, H))
    add_full(params["final"]["b"].reshape(1, H))

    kernel = _make_decoder_kernel(
        n_heads=n_heads, n_layers=L, d_k=d_k, has_cross=has_cross, n_q=BS,
        eps=1e-6, pe_scale=math.sqrt(H), attn_scale=1.0 / math.sqrt(d_k),
        feat=float(H))

    out = pl.pallas_call(
        kernel,
        out_shape=jax.ShapeDtypeStruct((BS, H), jnp.float32),
        grid=(L,),
        in_specs=in_specs,
        out_specs=pl.BlockSpec((BS, H), lambda l: (0, 0)),
        scratch_shapes=[pltpu.VMEM((BS, H), jnp.float32)],
        compiler_params=pltpu.CompilerParams(dimension_semantics=("arbitrary",)),
    )(*operands)
    return out.reshape(B, S, H)


# ----------------------------- params / buffers -----------------------------

def _linear_params(key, din, dout):
    kw, kb = jax.random.split(key)
    bound = 1.0 / math.sqrt(din)
    w = jax.random.uniform(kw, (din, dout), jnp.float32, -bound, bound)
    b = jax.random.uniform(kb, (dout,), jnp.float32, -bound, bound)
    return w, b


def init_decoder_params(key, n_hidden, n_layers, n_ff_hidden):
    layers = []
    for _ in range(n_layers):
        key, *ks = jax.random.split(key, 11)
        p = {"attn1": {}, "attn2": {}}
        for name, kk in zip(["q", "k", "v", "o"], ks[0:4]):
            w, b = _linear_params(kk, n_hidden, n_hidden)
            p["attn1"]["w" + name], p["attn1"]["b" + name] = w, b
        for name, kk in zip(["q", "k", "v", "o"], ks[4:8]):
            w, b = _linear_params(kk, n_hidden, n_hidden)
            p["attn2"]["w" + name], p["attn2"]["b" + name] = w, b
        w1, b1 = _linear_params(ks[8], n_hidden, n_ff_hidden)
        w2, b2 = _linear_params(ks[9], n_ff_hidden, n_hidden)
        p["ff"] = {"w1": w1, "b1": b1, "w2": w2, "b2": b2}
        for n in ["n1", "n2", "n3"]:
            p[n + "_a"] = jnp.ones((n_hidden,), jnp.float32)
            p[n + "_b"] = jnp.zeros((n_hidden,), jnp.float32)
        layers.append(p)
    final = {"a": jnp.ones((n_hidden,), jnp.float32),
             "b": jnp.zeros((n_hidden,), jnp.float32)}
    return {"layers": layers, "final": final}


def make_pe_table(max_length, n_hidden):
    # Exactly mirrors the (tutorial-style) PyTorch PositionalEncoder loop.
    pe = np.zeros((max_length, n_hidden), dtype=np.float32)
    for pos in range(max_length):
        for i in range(0, n_hidden, 2):
            pe[pos, i] = math.sin(pos / 10000 ** (2 * i / n_hidden))
            pe[pos, i + 1] = math.cos(pos / 10000 ** (2 * (i + 1) / n_hidden))
    return jnp.asarray(pe)


# ----------------------------- pure-JAX reference ---------------------------

def _ref_norm(x, a, b, eps=1e-6):
    mean = x.mean(-1, keepdims=True)
    std = jnp.sqrt(jnp.sum((x - mean) ** 2, -1, keepdims=True) / (x.shape[-1] - 1.0))
    return a * (x - mean) / (std + eps) + b


def _ref_mha(p, q_in, k_in, v_in, mask, n_heads):
    bsz, sq, h = q_in.shape
    skv = k_in.shape[1]
    d_k = h // n_heads
    q = (q_in @ p["wq"] + p["bq"]).reshape(bsz, sq, n_heads, d_k).transpose(0, 2, 1, 3)
    k = (k_in @ p["wk"] + p["bk"]).reshape(bsz, skv, n_heads, d_k).transpose(0, 2, 1, 3)
    v = (v_in @ p["wv"] + p["bv"]).reshape(bsz, skv, n_heads, d_k).transpose(0, 2, 1, 3)
    s = jnp.einsum("bhqd,bhkd->bhqk", q, k) / math.sqrt(d_k)
    s = jnp.where(mask[:, None] == 0.0, -1e9, s)
    a = jax.nn.softmax(s, -1)
    o = jnp.einsum("bhqk,bhkd->bhqd", a, v).transpose(0, 2, 1, 3).reshape(bsz, sq, h)
    return o @ p["wo"] + p["bo"]


def ref_decoder(params, pe_table, trg, trg_mask, e_outputs, src_mask, n_heads):
    _, s, h = trg.shape
    x = trg * math.sqrt(h) + pe_table[None, :s]
    for p in params["layers"]:
        x2 = _ref_norm(x, p["n1_a"], p["n1_b"])
        x = x + _ref_mha(p["attn1"], x2, x2, x2, trg_mask, n_heads)
        x2 = _ref_norm(x, p["n2_a"], p["n2_b"])
        if e_outputs is not None:
            x = x + _ref_mha(p["attn2"], x2, e_outputs, e_outputs, src_mask, n_heads)
            x2 = _ref_norm(x, p["n3_a"], p["n3_b"])
        hmid = jnp.maximum(x2 @ p["ff"]["w1"] + p["ff"]["b1"], 0.0)
        x = x + (hmid @ p["ff"]["w2"] + p["ff"]["b2"])
    return _ref_norm(x, params["final"]["a"], params["final"]["b"])


# ----------------------------------- main -----------------------------------

if __name__ == "__main__":
    B, S, H = 2, 8, 32
    n_heads, n_layers, n_ff = 4, 2, 64
    max_length = 16

    key = jax.random.PRNGKey(0)
    k1, k2, kp = jax.random.split(key, 3)
    trg = jax.random.normal(k1, (B, S, H), jnp.float32)
    e_outputs = jax.random.normal(k2, (B, S, H), jnp.float32)
    trg_mask = jnp.tile(jnp.tril(jnp.ones((S, S), jnp.float32))[None], (B, 1, 1))
    src_mask = jnp.ones((B, S, S), jnp.float32)

    params = init_decoder_params(kp, H, n_layers, n_ff)
    pe_table = make_pe_table(max_length, H)

    fwd = jax.jit(partial(decoder_forward, n_heads=n_heads))
    out = jax.block_until_ready(fwd(params, pe_table, trg, trg_mask, e_outputs, src_mask))

    ref = ref_decoder(params, pe_table, trg, trg_mask, e_outputs, src_mask, n_heads)
    assert out.shape == (B, S, H), out.shape
    max_err = float(jnp.max(jnp.abs(out - ref)))
    assert jnp.allclose(out, ref, rtol=2e-2, atol=2e-2), max_err

    print("KERNEL_OK")
</pallas_src>

<mosaic_0001>
module attributes {stable_mosaic.version = 11 : i64} {
  func.func @kernel(%arg0: i32, %arg1: memref<16x32xf32, #tpu.memory_space<vmem>>, %arg2: memref<16x32xf32, #tpu.memory_space<vmem>>, %arg3: memref<64x64xf32, #tpu.memory_space<vmem>>, %arg4: memref<16x32xbf16, #tpu.memory_space<vmem>>, %arg5: memref<64x64xf32, #tpu.memory_space<vmem>>, %arg6: memref<1x1x32xf32, #tpu.memory_space<vmem>>, %arg7: memref<1x1x32xf32, #tpu.memory_space<vmem>>, %arg8: memref<1x32x32xbf16, #tpu.memory_space<vmem>>, %arg9: memref<1x1x32xf32, #tpu.memory_space<vmem>>, %arg10: memref<1x32x32xbf16, #tpu.memory_space<vmem>>, %arg11: memref<1x1x32xf32, #tpu.memory_space<vmem>>, %arg12: memref<1x32x32xbf16, #tpu.memory_space<vmem>>, %arg13: memref<1x1x32xf32, #tpu.memory_space<vmem>>, %arg14: memref<1x32x32xbf16, #tpu.memory_space<vmem>>, %arg15: memref<1x1x32xf32, #tpu.memory_space<vmem>>, %arg16: memref<1x1x32xf32, #tpu.memory_space<vmem>>, %arg17: memref<1x1x32xf32, #tpu.memory_space<vmem>>, %arg18: memref<1x32x32xbf16, #tpu.memory_space<vmem>>, %arg19: memref<1x1x32xf32, #tpu.memory_space<vmem>>, %arg20: memref<1x32x32xbf16, #tpu.memory_space<vmem>>, %arg21: memref<1x1x32xf32, #tpu.memory_space<vmem>>, %arg22: memref<1x32x32xbf16, #tpu.memory_space<vmem>>, %arg23: memref<1x1x32xf32, #tpu.memory_space<vmem>>, %arg24: memref<1x32x32xbf16, #tpu.memory_space<vmem>>, %arg25: memref<1x1x32xf32, #tpu.memory_space<vmem>>, %arg26: memref<1x1x32xf32, #tpu.memory_space<vmem>>, %arg27: memref<1x1x32xf32, #tpu.memory_space<vmem>>, %arg28: memref<1x32x64xbf16, #tpu.memory_space<vmem>>, %arg29: memref<1x1x64xf32, #tpu.memory_space<vmem>>, %arg30: memref<1x64x32xbf16, #tpu.memory_space<vmem>>, %arg31: memref<1x1x32xf32, #tpu.memory_space<vmem>>, %arg32: memref<1x32xf32, #tpu.memory_space<vmem>>, %arg33: memref<1x32xf32, #tpu.memory_space<vmem>>, %arg34: memref<16x32xf32, #tpu.memory_space<vmem>>, %arg35: memref<16x32xf32, #tpu.memory_space<vmem>>) attributes {dimension_semantics = [#tpu.dimension_semantics<arbitrary>], iteration_bounds = array<i64: 2>, scalar_prefetch = 0 : i64, scratch_operands = 1 : i64, tpu.core_type = #tpu.core_type<tc>, window_params = [{pipeline_mode = #tpu.pipeline_mode<synchronous>, transform_indices = @transform_0, window_bounds = array<i64: 16, 32>}, {pipeline_mode = #tpu.pipeline_mode<synchronous>, transform_indices = @transform_1, window_bounds = array<i64: 16, 32>}, {pipeline_mode = #tpu.pipeline_mode<synchronous>, transform_indices = @transform_2, window_bounds = array<i64: 64, 64>}, {pipeline_mode = #tpu.pipeline_mode<synchronous>, transform_indices = @transform_3, window_bounds = array<i64: 16, 32>}, {pipeline_mode = #tpu.pipeline_mode<synchronous>, transform_indices = @transform_4, window_bounds = array<i64: 64, 64>}, {transform_indices = @transform_5, window_bounds = array<i64: 1, 1, 32>}, {transform_indices = @transform_6, window_bounds = array<i64: 1, 1, 32>}, {transform_indices = @transform_7, window_bounds = array<i64: 1, 32, 32>}, {transform_indices = @transform_8, window_bounds = array<i64: 1, 1, 32>}, {transform_indices = @transform_9, window_bounds = array<i64: 1, 32, 32>}, {transform_indices = @transform_10, window_bounds = array<i64: 1, 1, 32>}, {transform_indices = @transform_11, window_bounds = array<i64: 1, 32, 32>}, {transform_indices = @transform_12, window_bounds = array<i64: 1, 1, 32>}, {transform_indices = @transform_13, window_bounds = array<i64: 1, 32, 32>}, {transform_indices = @transform_14, window_bounds = array<i64: 1, 1, 32>}, {transform_indices = @transform_15, window_bounds = array<i64: 1, 1, 32>}, {transform_indices = @transform_16, window_bounds = array<i64: 1, 1, 32>}, {transform_indices = @transform_17, window_bounds = array<i64: 1, 32, 32>}, {transform_indices = @transform_18, window_bounds = array<i64: 1, 1, 32>}, {transform_indices = @transform_19, window_bounds = array<i64: 1, 32, 32>}, {transform_indices = @transform_20, window_bounds = array<i64: 1, 1, 32>}, {transform_indices = @transform_21, window_bounds = array<i64: 1, 32, 32>}, {transform_indices = @transform_22, window_bounds = array<i64: 1, 1, 32>}, {transform_indices = @transform_23, window_bounds = array<i64: 1, 32, 32>}, {transform_indices = @transform_24, window_bounds = array<i64: 1, 1, 32>}, {transform_indices = @transform_25, window_bounds = array<i64: 1, 1, 32>}, {transform_indices = @transform_26, window_bounds = array<i64: 1, 1, 32>}, {transform_indices = @transform_27, window_bounds = array<i64: 1, 32, 64>}, {transform_indices = @transform_28, window_bounds = array<i64: 1, 1, 64>}, {transform_indices = @transform_29, window_bounds = array<i64: 1, 64, 32>}, {transform_indices = @transform_30, window_bounds = array<i64: 1, 1, 32>}, {pipeline_mode = #tpu.pipeline_mode<synchronous>, transform_indices = @transform_31, window_bounds = array<i64: 1, 32>}, {pipeline_mode = #tpu.pipeline_mode<synchronous>, transform_indices = @transform_32, window_bounds = array<i64: 1, 32>}, {pipeline_mode = #tpu.pipeline_mode<synchronous>, transform_indices = @transform_33, window_bounds = array<i64: 16, 32>}]} {
    %c0_i32 = arith.constant 0 : i32
    %0 = arith.cmpi eq, %arg0, %c0_i32 : i32
    %1 = arith.extui %0 : i1 to i32
    %c0_i32_0 = arith.constant 0 : i32
    %2 = arith.cmpi ne, %1, %c0_i32_0 : i32
    scf.if %2 {
      %c0_124 = arith.constant 0 : index
      %c0_125 = arith.constant 0 : index
      %245 = vector.load %arg1[%c0_124, %c0_125] : memref<16x32xf32, #tpu.memory_space<vmem>>, vector<16x32xf32>
      %cst_126 = arith.constant 5.65685415 : f32
      %246 = vector.broadcast %cst_126 : f32 to vector<16x32xf32>
      %247 = arith.mulf %245, %246 : vector<16x32xf32>
      %c0_127 = arith.constant 0 : index
      %c0_128 = arith.constant 0 : index
      %248 = vector.load %arg2[%c0_127, %c0_128] : memref<16x32xf32, #tpu.memory_space<vmem>>, vector<16x32xf32>
      %249 = arith.addf %247, %248 : vector<16x32xf32>
      %c0_129 = arith.constant 0 : index
      %c0_130 = arith.constant 0 : index
      %250 = vector.load %arg35[%c0_129, %c0_130] : memref<16x32xf32, #tpu.memory_space<vmem>>, vector<16x32xf32>
      tpu.vector_store %arg35[%c0_129, %c0_130], %249 {strides = array<i32>} : memref<16x32xf32, #tpu.memory_space<vmem>>, vector<16x32xf32>,
    } else {
    }
    %c0 = arith.constant 0 : index
    %c0_1 = arith.constant 0 : index
    %3 = vector.load %arg35[%c0, %c0_1] : memref<16x32xf32, #tpu.memory_space<vmem>>, vector<16x32xf32>
    %c0_2 = arith.constant 0 : index
    %c0_3 = arith.constant 0 : index
    %c0_4 = arith.constant 0 : index
    %4 = vector.load %arg6[%c0_2, %c0_3, %c0_4] : memref<1x1x32xf32, #tpu.memory_space<vmem>>, vector<1x1x32xf32>
    %5 = vector.shape_cast %4 : vector<1x1x32xf32> to vector<1x32xf32>
    %c0_5 = arith.constant 0 : index
    %c0_6 = arith.constant 0 : index
    %c0_7 = arith.constant 0 : index
    %6 = vector.load %arg7[%c0_5, %c0_6, %c0_7] : memref<1x1x32xf32, #tpu.memory_space<vmem>>, vector<1x1x32xf32>
    %7 = vector.shape_cast %6 : vector<1x1x32xf32> to vector<1x32xf32>
    %cst = arith.constant dense<0.000000e+00> : vector<16xf32>
    %8 = vector.multi_reduction <add>, %3, %cst [1] : vector<16x32xf32> to vector<16xf32>
    %9 = vector.shape_cast %8 : vector<16xf32> to vector<16x1xf32>
    %cst_8 = arith.constant 3.200000e+01 : f32
    %10 = vector.broadcast %cst_8 : f32 to vector<16x1xf32>
    %11 = arith.divf %9, %10 : vector<16x1xf32>
    %12 = vector.broadcast %11 : vector<16x1xf32> to vector<16x32xf32>
    %13 = arith.subf %3, %12 : vector<16x32xf32>
    %14 = arith.mulf %13, %13 : vector<16x32xf32>
    %cst_9 = arith.constant dense<0.000000e+00> : vector<16xf32>
    %15 = vector.multi_reduction <add>, %14, %cst_9 [1] : vector<16x32xf32> to vector<16xf32>
    %16 = vector.shape_cast %15 : vector<16xf32> to vector<16x1xf32>
    %cst_10 = arith.constant 0.0322580636 : f32
    %17 = vector.broadcast %cst_10 : f32 to vector<16x1xf32>
    %18 = arith.mulf %16, %17 : vector<16x1xf32>
    %19 = math.sqrt %18 : vector<16x1xf32>
    %cst_11 = arith.constant 9.99999997E-7 : f32
    %20 = vector.broadcast %cst_11 : f32 to vector<16x1xf32>
    %21 = arith.addf %19, %20 : vector<16x1xf32>
    %22 = tpu.reciprocal %21 : vector<16x1xf32> -> vector<16x1xf32>
    %23 = vector.broadcast %22 : vector<16x1xf32> to vector<16x32xf32>
    %24 = arith.mulf %13, %23 : vector<16x32xf32>
    %25 = vector.broadcast %5 : vector<1x32xf32> to vector<16x32xf32>
    %26 = arith.mulf %25, %24 : vector<16x32xf32>
    %27 = vector.broadcast %7 : vector<1x32xf32> to vector<16x32xf32>
    %28 = arith.addf %26, %27 : vector<16x32xf32>
    %29 = arith.truncf %28 : vector<16x32xf32> to vector<16x32xbf16>
    %c0_12 = arith.constant 0 : index
    %c0_13 = arith.constant 0 : index
    %30 = vector.load %arg3[%c0_12, %c0_13] : memref<64x64xf32, #tpu.memory_space<vmem>>, vector<64x64xf32>
    %c0_14 = arith.constant 0 : index
    %c0_15 = arith.constant 0 : index
    %c0_16 = arith.constant 0 : index
    %31 = vector.load %arg8[%c0_14, %c0_15, %c0_16] : memref<1x32x32xbf16, #tpu.memory_space<vmem>>, vector<1x32x32xbf16>
    %32 = vector.shape_cast %31 : vector<1x32x32xbf16> to vector<32x32xbf16>
    %c0_17 = arith.constant 0 : index
    %c0_18 = arith.constant 0 : index
    %c0_19 = arith.constant 0 : index
    %33 = vector.load %arg9[%c0_17, %c0_18, %c0_19] : memref<1x1x32xf32, #tpu.memory_space<vmem>>, vector<1x1x32xf32>
    %34 = vector.shape_cast %33 : vector<1x1x32xf32> to vector<1x32xf32>
    %c0_20 = arith.constant 0 : index
    %c0_21 = arith.constant 0 : index
    %c0_22 = arith.constant 0 : index
    %35 = vector.load %arg10[%c0_20, %c0_21, %c0_22] : memref<1x32x32xbf16, #tpu.memory_space<vmem>>, vector<1x32x32xbf16>
    %36 = vector.shape_cast %35 : vector<1x32x32xbf16> to vector<32x32xbf16>
    %c0_23 = arith.constant 0 : index
    %c0_24 = arith.constant 0 : index
    %c0_25 = arith.constant 0 : index
    %37 = vector.load %arg11[%c0_23, %c0_24, %c0_25] : memref<1x1x32xf32, #tpu.memory_space<vmem>>, vector<1x1x32xf32>
    %38 = vector.shape_cast %37 : vector<1x1x32xf32> to vector<1x32xf32>
    %c0_26 = arith.constant 0 : index
    %c0_27 = arith.constant 0 : index
    %c0_28 = arith.constant 0 : index
    %39 = vector.load %arg12[%c0_26, %c0_27, %c0_28] : memref<1x32x32xbf16, #tpu.memory_space<vmem>>, vector<1x32x32xbf16>
    %40 = vector.shape_cast %39 : vector<1x32x32xbf16> to vector<32x32xbf16>
    %c0_29 = arith.constant 0 : index
    %c0_30 = arith.constant 0 : index
    %c0_31 = arith.constant 0 : index
    %41 = vector.load %arg13[%c0_29, %c0_30, %c0_31] : memref<1x1x32xf32, #tpu.memory_space<vmem>>, vector<1x1x32xf32>
    %42 = vector.shape_cast %41 : vector<1x1x32xf32> to vector<1x32xf32>
    %c0_32 = arith.constant 0 : index
    %c0_33 = arith.constant 0 : index
    %c0_34 = arith.constant 0 : index
    %43 = vector.load %arg14[%c0_32, %c0_33, %c0_34] : memref<1x32x32xbf16, #tpu.memory_space<vmem>>, vector<1x32x32xbf16>
    %44 = vector.shape_cast %43 : vector<1x32x32xbf16> to vector<32x32xbf16>
    %c0_35 = arith.constant 0 : index
    %c0_36 = arith.constant 0 : index
    %c0_37 = arith.constant 0 : index
    %45 = vector.load %arg15[%c0_35, %c0_36, %c0_37] : memref<1x1x32xf32, #tpu.memory_space<vmem>>, vector<1x1x32xf32>
    %46 = vector.shape_cast %45 : vector<1x1x32xf32> to vector<1x32xf32>
    %cst_38 = arith.constant dense<0.000000e+00> : vector<16x32xf32>
    %47 = tpu.matmul %29, %32, %cst_38 {dimension_numbers = #tpu.dot_dimension_numbers<[1], [0], [0], [1], [0, 0, 1, 1], [], []>} : vector<16x32xbf16>, vector<32x32xbf16>, vector<16x32xf32> -> vector<16x32xf32>
    %48 = vector.broadcast %34 : vector<1x32xf32> to vector<16x32xf32>
    %49 = arith.addf %47, %48 : vector<16x32xf32>
    %cst_39 = arith.constant dense<0.000000e+00> : vector<16x32xf32>
    %50 = tpu.matmul %29, %36, %cst_39 {dimension_numbers = #tpu.dot_dimension_numbers<[1], [0], [0], [1], [0, 0, 1, 1], [], []>} : vector<16x32xbf16>, vector<32x32xbf16>, vector<16x32xf32> -> vector<16x32xf32>
    %51 = vector.broadcast %38 : vector<1x32xf32> to vector<16x32xf32>
    %52 = arith.addf %50, %51 : vector<16x32xf32>
    %cst_40 = arith.constant dense<0.000000e+00> : vector<16x32xf32>
    %53 = tpu.matmul %29, %40, %cst_40 {dimension_numbers = #tpu.dot_dimension_numbers<[1], [0], [0], [1], [0, 0, 1, 1], [], []>} : vector<16x32xbf16>, vector<32x32xbf16>, vector<16x32xf32> -> vector<16x32xf32>
    %54 = vector.broadcast %42 : vector<1x32xf32> to vector<16x32xf32>
    %55 = arith.addf %53, %54 : vector<16x32xf32>
    %56 = vector.extract_strided_slice %49 {offsets = [0, 0], sizes = [16, 8], strides = [1, 1]} : vector<16x32xf32> to vector<16x8xf32>
    %57 = vector.extract_strided_slice %49 {offsets = [0, 8], sizes = [16, 8], strides = [1, 1]} : vector<16x32xf32> to vector<16x8xf32>
    %58 = vector.extract_strided_slice %49 {offsets = [0, 16], sizes = [16, 8], strides = [1, 1]} : vector<16x32xf32> to vector<16x8xf32>
    %59 = vector.extract_strided_slice %49 {offsets = [0, 24], sizes = [16, 8], strides = [1, 1]} : vector<16x32xf32> to vector<16x8xf32>
    %60 = tpu.concatenate %56, %57, %58, %59 in 0 : vector<16x8xf32>, vector<16x8xf32>, vector<16x8xf32>, vector<16x8xf32> -> vector<64x8xf32>
    %61 = arith.truncf %60 : vector<64x8xf32> to vector<64x8xbf16>
    %62 = vector.extract_strided_slice %52 {offsets = [0, 0], sizes = [16, 8], strides = [1, 1]} : vector<16x32xf32> to vector<16x8xf32>
    %63 = vector.extract_strided_slice %52 {offsets = [0, 8], sizes = [16, 8], strides = [1, 1]} : vector<16x32xf32> to vector<16x8xf32>
    %64 = vector.extract_strided_slice %52 {offsets = [0, 16], sizes = [16, 8], strides = [1, 1]} : vector<16x32xf32> to vector<16x8xf32>
    %65 = vector.extract_strided_slice %52 {offsets = [0, 24], sizes = [16, 8], strides = [1, 1]} : vector<16x32xf32> to vector<16x8xf32>
    %66 = tpu.concatenate %62, %63, %64, %65 in 0 : vector<16x8xf32>, vector<16x8xf32>, vector<16x8xf32>, vector<16x8xf32> -> vector<64x8xf32>
    %67 = arith.truncf %66 : vector<64x8xf32> to vector<64x8xbf16>
    %68 = vector.extract_strided_slice %55 {offsets = [0, 0], sizes = [16, 8], strides = [1, 1]} : vector<16x32xf32> to vector<16x8xf32>
    %69 = vector.extract_strided_slice %55 {offsets = [0, 8], sizes = [16, 8], strides = [1, 1]} : vector<16x32xf32> to vector<16x8xf32>
    %70 = vector.extract_strided_slice %55 {offsets = [0, 16], sizes = [16, 8], strides = [1, 1]} : vector<16x32xf32> to vector<16x8xf32>
    %71 = vector.extract_strided_slice %55 {offsets = [0, 24], sizes = [16, 8], strides = [1, 1]} : vector<16x32xf32> to vector<16x8xf32>
    %72 = tpu.concatenate %68, %69, %70, %71 in 0 : vector<16x8xf32>, vector<16x8xf32>, vector<16x8xf32>, vector<16x8xf32> -> vector<64x8xf32>
    %73 = arith.truncf %72 : vector<64x8xf32> to vector<64x8xbf16>
    %cst_41 = arith.constant dense<0.000000e+00> : vector<64x64xf32>
    %74 = tpu.matmul %61, %67, %cst_41 {dimension_numbers = #tpu.dot_dimension_numbers<[1], [1], [0], [0], [0, 0, 1, 0], [], []>} : vector<64x8xbf16>, vector<64x8xbf16>, vector<64x64xf32> -> vector<64x64xf32>
    %cst_42 = arith.constant 0.353553385 : f32
    %75 = vector.broadcast %cst_42 : f32 to vector<64x64xf32>
    %76 = arith.mulf %74, %75 : vector<64x64xf32>
    %77 = arith.addf %76, %30 : vector<64x64xf32>
    %cst_43 = arith.constant dense<0xFF800000> : vector<64xf32>
    %78 = vector.multi_reduction <maximumf>, %77, %cst_43 [1] : vector<64x64xf32> to vector<64xf32>
    %79 = vector.shape_cast %78 : vector<64xf32> to vector<64x1xf32>
    %80 = vector.broadcast %79 : vector<64x1xf32> to vector<64x64xf32>
    %81 = arith.subf %77, %80 : vector<64x64xf32>
    %82 = math.exp %81 : vector<64x64xf32>
    %cst_44 = arith.constant dense<0.000000e+00> : vector<64xf32>
    %83 = vector.multi_reduction <add>, %82, %cst_44 [1] : vector<64x64xf32> to vector<64xf32>
    %84 = vector.shape_cast %83 : vector<64xf32> to vector<64x1xf32>
    %85 = tpu.reciprocal %84 {approx = true} : vector<64x1xf32> -> vector<64x1xf32>
    %86 = vector.broadcast %85 : vector<64x1xf32> to vector<64x64xf32>
    %87 = arith.mulf %82, %86 : vector<64x64xf32>
    %88 = arith.truncf %87 : vector<64x64xf32> to vector<64x64xbf16>
    %cst_45 = arith.constant dense<0.000000e+00> : vector<64x8xf32>
    %89 = tpu.matmul %88, %73, %cst_45 {dimension_numbers = #tpu.dot_dimension_numbers<[1], [0], [0], [1], [0, 0, 1, 1], [], []>} : vector<64x64xbf16>, vector<64x8xbf16>, vector<64x8xf32> -> vector<64x8xf32>
    %90 = vector.extract_strided_slice %89 {offsets = [0, 0], sizes = [16, 8], strides = [1, 1]} : vector<64x8xf32> to vector<16x8xf32>
    %91 = vector.extract_strided_slice %89 {offsets = [16, 0], sizes = [16, 8], strides = [1, 1]} : vector<64x8xf32> to vector<16x8xf32>
    %92 = vector.extract_strided_slice %89 {offsets = [32, 0], sizes = [16, 8], strides = [1, 1]} : vector<64x8xf32> to vector<16x8xf32>
    %93 = vector.extract_strided_slice %89 {offsets = [48, 0], sizes = [16, 8], strides = [1, 1]} : vector<64x8xf32> to vector<16x8xf32>
    %94 = tpu.concatenate %90, %91, %92, %93 in 1 : vector<16x8xf32>, vector<16x8xf32>, vector<16x8xf32>, vector<16x8xf32> -> vector<16x32xf32>
    %95 = arith.truncf %94 : vector<16x32xf32> to vector<16x32xbf16>
    %cst_46 = arith.constant dense<0.000000e+00> : vector<16x32xf32>
    %96 = tpu.matmul %95, %44, %cst_46 {dimension_numbers = #tpu.dot_dimension_numbers<[1], [0], [0], [1], [0, 0, 1, 1], [], []>} : vector<16x32xbf16>, vector<32x32xbf16>, vector<16x32xf32> -> vector<16x32xf32>
    %97 = vector.broadcast %46 : vector<1x32xf32> to vector<16x32xf32>
    %98 = arith.addf %96, %97 : vector<16x32xf32>
    %99 = arith.addf %3, %98 : vector<16x32xf32>
    %c0_47 = arith.constant 0 : index
    %c0_48 = arith.constant 0 : index
    %c0_49 = arith.constant 0 : index
    %100 = vector.load %arg16[%c0_47, %c0_48, %c0_49] : memref<1x1x32xf32, #tpu.memory_space<vmem>>, vector<1x1x32xf32>
    %101 = vector.shape_cast %100 : vector<1x1x32xf32> to vector<1x32xf32>
    %c0_50 = arith.constant 0 : index
    %c0_51 = arith.constant 0 : index
    %c0_52 = arith.constant 0 : index
    %102 = vector.load %arg17[%c0_50, %c0_51, %c0_52] : memref<1x1x32xf32, #tpu.memory_space<vmem>>, vector<1x1x32xf32>
    %103 = vector.shape_cast %102 : vector<1x1x32xf32> to vector<1x32xf32>
    %cst_53 = arith.constant dense<0.000000e+00> : vector<16xf32>
    %104 = vector.multi_reduction <add>, %99, %cst_53 [1] : vector<16x32xf32> to vector<16xf32>
    %105 = vector.shape_cast %104 : vector<16xf32> to vector<16x1xf32>
    %cst_54 = arith.constant 3.200000e+01 : f32
    %106 = vector.broadcast %cst_54 : f32 to vector<16x1xf32>
    %107 = arith.divf %105, %106 : vector<16x1xf32>
    %108 = vector.broadcast %107 : vector<16x1xf32> to vector<16x32xf32>
    %109 = arith.subf %99, %108 : vector<16x32xf32>
    %110 = arith.mulf %109, %109 : vector<16x32xf32>
    %cst_55 = arith.constant dense<0.000000e+00> : vector<16xf32>
    %111 = vector.multi_reduction <add>, %110, %cst_55 [1] : vector<16x32xf32> to vector<16xf32>
    %112 = vector.shape_cast %111 : vector<16xf32> to vector<16x1xf32>
    %cst_56 = arith.constant 0.0322580636 : f32
    %113 = vector.broadcast %cst_56 : f32 to vector<16x1xf32>
    %114 = arith.mulf %112, %113 : vector<16x1xf32>
    %115 = math.sqrt %114 : vector<16x1xf32>
    %cst_57 = arith.constant 9.99999997E-7 : f32
    %116 = vector.broadcast %cst_57 : f32 to vector<16x1xf32>
    %117 = arith.addf %115, %116 : vector<16x1xf32>
    %118 = tpu.reciprocal %117 : vector<16x1xf32> -> vector<16x1xf32>
    %119 = vector.broadcast %118 : vector<16x1xf32> to vector<16x32xf32>
    %120 = arith.mulf %109, %119 : vector<16x32xf32>
    %121 = vector.broadcast %101 : vector<1x32xf32> to vector<16x32xf32>
    %122 = arith.mulf %121, %120 : vector<16x32xf32>
    %123 = vector.broadcast %103 : vector<1x32xf32> to vector<16x32xf32>
    %124 = arith.addf %122, %123 : vector<16x32xf32>
    %125 = arith.truncf %124 : vector<16x32xf32> to vector<16x32xbf16>
    %c0_58 = arith.constant 0 : index
    %c0_59 = arith.constant 0 : index
    %126 = vector.load %arg4[%c0_58, %c0_59] : memref<16x32xbf16, #tpu.memory_space<vmem>>, vector<16x32xbf16>
    %c0_60 = arith.constant 0 : index
    %c0_61 = arith.constant 0 : index
    %127 = vector.load %arg5[%c0_60, %c0_61] : memref<64x64xf32, #tpu.memory_space<vmem>>, vector<64x64xf32>
    %c0_62 = arith.constant 0 : index
    %c0_63 = arith.constant 0 : index
    %c0_64 = arith.constant 0 : index
    %128 = vector.load %arg18[%c0_62, %c0_63, %c0_64] : memref<1x32x32xbf16, #tpu.memory_space<vmem>>, vector<1x32x32xbf16>
    %129 = vector.shape_cast %128 : vector<1x32x32xbf16> to vector<32x32xbf16>
    %c0_65 = arith.constant 0 : index
    %c0_66 = arith.constant 0 : index
    %c0_67 = arith.constant 0 : index
    %130 = vector.load %arg19[%c0_65, %c0_66, %c0_67] : memref<1x1x32xf32, #tpu.memory_space<vmem>>, vector<1x1x32xf32>
    %131 = vector.shape_cast %130 : vector<1x1x32xf32> to vector<1x32xf32>
    %c0_68 = arith.constant 0 : index
    %c0_69 = arith.constant 0 : index
    %c0_70 = arith.constant 0 : index
    %132 = vector.load %arg20[%c0_68, %c0_69, %c0_70] : memref<1x32x32xbf16, #tpu.memory_space<vmem>>, vector<1x32x32xbf16>
    %133 = vector.shape_cast %132 : vector<1x32x32xbf16> to vector<32x32xbf16>
    %c0_71 = arith.constant 0 : index
    %c0_72 = arith.constant 0 : index
    %c0_73 = arith.constant 0 : index
    %134 = vector.load %arg21[%c0_71, %c0_72, %c0_73] : memref<1x1x32xf32, #tpu.memory_space<vmem>>, vector<1x1x32xf32>
    %135 = vector.shape_cast %134 : vector<1x1x32xf32> to vector<1x32xf32>
    %c0_74 = arith.constant 0 : index
    %c0_75 = arith.constant 0 : index
    %c0_76 = arith.constant 0 : index
    %136 = vector.load %arg22[%c0_74, %c0_75, %c0_76] : memref<1x32x32xbf16, #tpu.memory_space<vmem>>, vector<1x32x32xbf16>
    %137 = vector.shape_cast %136 : vector<1x32x32xbf16> to vector<32x32xbf16>
    %c0_77 = arith.constant 0 : index
    %c0_78 = arith.constant 0 : index
    %c0_79 = arith.constant 0 : index
    %138 = vector.load %arg23[%c0_77, %c0_78, %c0_79] : memref<1x1x32xf32, #tpu.memory_space<vmem>>, vector<1x1x32xf32>
    %139 = vector.shape_cast %138 : vector<1x1x32xf32> to vector<1x32xf32>
    %c0_80 = arith.constant 0 : index
    %c0_81 = arith.constant 0 : index
    %c0_82 = arith.constant 0 : index
    %140 = vector.load %arg24[%c0_80, %c0_81, %c0_82] : memref<1x32x32xbf16, #tpu.memory_space<vmem>>, vector<1x32x32xbf16>
    %141 = vector.shape_cast %140 : vector<1x32x32xbf16> to vector<32x32xbf16>
    %c0_83 = arith.constant 0 : index
    %c0_84 = arith.constant 0 : index
    %c0_85 = arith.constant 0 : index
    %142 = vector.load %arg25[%c0_83, %c0_84, %c0_85] : memref<1x1x32xf32, #tpu.memory_space<vmem>>, vector<1x1x32xf32>
    %143 = vector.shape_cast %142 : vector<1x1x32xf32> to vector<1x32xf32>
    %cst_86 = arith.constant dense<0.000000e+00> : vector<16x32xf32>
    %144 = tpu.matmul %125, %129, %cst_86 {dimension_numbers = #tpu.dot_dimension_numbers<[1], [0], [0], [1], [0, 0, 1, 1], [], []>} : vector<16x32xbf16>, vector<32x32xbf16>, vector<16x32xf32> -> vector<16x32xf32>
    %145 = vector.broadcast %131 : vector<1x32xf32> to vector<16x32xf32>
    %146 = arith.addf %144, %145 : vector<16x32xf32>
    %cst_87 = arith.constant dense<0.000000e+00> : vector<16x32xf32>
    %147 = tpu.matmul %126, %133, %cst_87 {dimension_numbers = #tpu.dot_dimension_numbers<[1], [0], [0], [1], [0, 0, 1, 1], [], []>} : vector<16x32xbf16>, vector<32x32xbf16>, vector<16x32xf32> -> vector<16x32xf32>
    %148 = vector.broadcast %135 : vector<1x32xf32> to vector<16x32xf32>
    %149 = arith.addf %147, %148 : vector<16x32xf32>
    %cst_88 = arith.constant dense<0.000000e+00> : vector<16x32xf32>
    %150 = tpu.matmul %126, %137, %cst_88 {dimension_numbers = #tpu.dot_dimension_numbers<[1], [0], [0], [1], [0, 0, 1, 1], [], []>} : vector<16x32xbf16>, vector<32x32xbf16>, vector<16x32xf32> -> vector<16x32xf32>
    %151 = vector.broadcast %139 : vector<1x32xf32> to vector<16x32xf32>
    %152 = arith.addf %150, %151 : vector<16x32xf32>
    %153 = vector.extract_strided_slice %146 {offsets = [0, 0], sizes = [16, 8], strides = [1, 1]} : vector<16x32xf32> to vector<16x8xf32>
    %154 = vector.extract_strided_slice %146 {offsets = [0, 8], sizes = [16, 8], strides = [1, 1]} : vector<16x32xf32> to vector<16x8xf32>
    %155 = vector.extract_strided_slice %146 {offsets = [0, 16], sizes = [16, 8], strides = [1, 1]} : vector<16x32xf32> to vector<16x8xf32>
    %156 = vector.extract_strided_slice %146 {offsets = [0, 24], sizes = [16, 8], strides = [1, 1]} : vector<16x32xf32> to vector<16x8xf32>
    %157 = tpu.concatenate %153, %154, %155, %156 in 0 : vector<16x8xf32>, vector<16x8xf32>, vector<16x8xf32>, vector<16x8xf32> -> vector<64x8xf32>
    %158 = arith.truncf %157 : vector<64x8xf32> to vector<64x8xbf16>
    %159 = vector.extract_strided_slice %149 {offsets = [0, 0], sizes = [16, 8], strides = [1, 1]} : vector<16x32xf32> to vector<16x8xf32>
    %160 = vector.extract_strided_slice %149 {offsets = [0, 8], sizes = [16, 8], strides = [1, 1]} : vector<16x32xf32> to vector<16x8xf32>
    %161 = vector.extract_strided_slice %149 {offsets = [0, 16], sizes = [16, 8], strides = [1, 1]} : vector<16x32xf32> to vector<16x8xf32>
    %162 = vector.extract_strided_slice %149 {offsets = [0, 24], sizes = [16, 8], strides = [1, 1]} : vector<16x32xf32> to vector<16x8xf32>
    %163 = tpu.concatenate %159, %160, %161, %162 in 0 : vector<16x8xf32>, vector<16x8xf32>, vector<16x8xf32>, vector<16x8xf32> -> vector<64x8xf32>
    %164 = arith.truncf %163 : vector<64x8xf32> to vector<64x8xbf16>
    %165 = vector.extract_strided_slice %152 {offsets = [0, 0], sizes = [16, 8], strides = [1, 1]} : vector<16x32xf32> to vector<16x8xf32>
    %166 = vector.extract_strided_slice %152 {offsets = [0, 8], sizes = [16, 8], strides = [1, 1]} : vector<16x32xf32> to vector<16x8xf32>
    %167 = vector.extract_strided_slice %152 {offsets = [0, 16], sizes = [16, 8], strides = [1, 1]} : vector<16x32xf32> to vector<16x8xf32>
    %168 = vector.extract_strided_slice %152 {offsets = [0, 24], sizes = [16, 8], strides = [1, 1]} : vector<16x32xf32> to vector<16x8xf32>
    %169 = tpu.concatenate %165, %166, %167, %168 in 0 : vector<16x8xf32>, vector<16x8xf32>, vector<16x8xf32>, vector<16x8xf32> -> vector<64x8xf32>
    %170 = arith.truncf %169 : vector<64x8xf32> to vector<64x8xbf16>
    %cst_89 = arith.constant dense<0.000000e+00> : vector<64x64xf32>
    %171 = tpu.matmul %158, %164, %cst_89 {dimension_numbers = #tpu.dot_dimension_numbers<[1], [1], [0], [0], [0, 0, 1, 0], [], []>} : vector<64x8xbf16>, vector<64x8xbf16>, vector<64x64xf32> -> vector<64x64xf32>
    %cst_90 = arith.constant 0.353553385 : f32
    %172 = vector.broadcast %cst_90 : f32 to vector<64x64xf32>
    %173 = arith.mulf %171, %172 : vector<64x64xf32>
    %174 = arith.addf %173, %127 : vector<64x64xf32>
    %cst_91 = arith.constant dense<0xFF800000> : vector<64xf32>
    %175 = vector.multi_reduction <maximumf>, %174, %cst_91 [1] : vector<64x64xf32> to vector<64xf32>
    %176 = vector.shape_cast %175 : vector<64xf32> to vector<64x1xf32>
    %177 = vector.broadcast %176 : vector<64x1xf32> to vector<64x64xf32>
    %178 = arith.subf %174, %177 : vector<64x64xf32>
    %179 = math.exp %178 : vector<64x64xf32>
    %cst_92 = arith.constant dense<0.000000e+00> : vector<64xf32>
    %180 = vector.multi_reduction <add>, %179, %cst_92 [1] : vector<64x64xf32> to vector<64xf32>
    %181 = vector.shape_cast %180 : vector<64xf32> to vector<64x1xf32>
    %182 = tpu.reciprocal %181 {approx = true} : vector<64x1xf32> -> vector<64x1xf32>
    %183 = vector.broadcast %182 : vector<64x1xf32> to vector<64x64xf32>
    %184 = arith.mulf %179, %183 : vector<64x64xf32>
    %185 = arith.truncf %184 : vector<64x64xf32> to vector<64x64xbf16>
    %cst_93 = arith.constant dense<0.000000e+00> : vector<64x8xf32>
    %186 = tpu.matmul %185, %170, %cst_93 {dimension_numbers = #tpu.dot_dimension_numbers<[1], [0], [0], [1], [0, 0, 1, 1], [], []>} : vector<64x64xbf16>, vector<64x8xbf16>, vector<64x8xf32> -> vector<64x8xf32>
    %187 = vector.extract_strided_slice %186 {offsets = [0, 0], sizes = [16, 8], strides = [1, 1]} : vector<64x8xf32> to vector<16x8xf32>
    %188 = vector.extract_strided_slice %186 {offsets = [16, 0], sizes = [16, 8], strides = [1, 1]} : vector<64x8xf32> to vector<16x8xf32>
    %189 = vector.extract_strided_slice %186 {offsets = [32, 0], sizes = [16, 8], strides = [1, 1]} : vector<64x8xf32> to vector<16x8xf32>
    %190 = vector.extract_strided_slice %186 {offsets = [48, 0], sizes = [16, 8], strides = [1, 1]} : vector<64x8xf32> to vector<16x8xf32>
    %191 = tpu.concatenate %187, %188, %189, %190 in 1 : vector<16x8xf32>, vector<16x8xf32>, vector<16x8xf32>, vector<16x8xf32> -> vector<16x32xf32>
    %192 = arith.truncf %191 : vector<16x32xf32> to vector<16x32xbf16>
    %cst_94 = arith.constant dense<0.000000e+00> : vector<16x32xf32>
    %193 = tpu.matmul %192, %141, %cst_94 {dimension_numbers = #tpu.dot_dimension_numbers<[1], [0], [0], [1], [0, 0, 1, 1], [], []>} : vector<16x32xbf16>, vector<32x32xbf16>, vector<16x32xf32> -> vector<16x32xf32>
    %194 = vector.broadcast %143 : vector<1x32xf32> to vector<16x32xf32>
    %195 = arith.addf %193, %194 : vector<16x32xf32>
    %196 = arith.addf %99, %195 : vector<16x32xf32>
    %c0_95 = arith.constant 0 : index
    %c0_96 = arith.constant 0 : index
    %c0_97 = arith.constant 0 : index
    %197 = vector.load %arg26[%c0_95, %c0_96, %c0_97] : memref<1x1x32xf32, #tpu.memory_space<vmem>>, vector<1x1x32xf32>
    %198 = vector.shape_cast %197 : vector<1x1x32xf32> to vector<1x32xf32>
    %c0_98 = arith.constant 0 : index
    %c0_99 = arith.constant 0 : index
    %c0_100 = arith.constant 0 : index
    %199 = vector.load %arg27[%c0_98, %c0_99, %c0_100] : memref<1x1x32xf32, #tpu.memory_space<vmem>>, vector<1x1x32xf32>
    %200 = vector.shape_cast %199 : vector<1x1x32xf32> to vector<1x32xf32>
    %cst_101 = arith.constant dense<0.000000e+00> : vector<16xf32>
    %201 = vector.multi_reduction <add>, %196, %cst_101 [1] : vector<16x32xf32> to vector<16xf32>
    %202 = vector.shape_cast %201 : vector<16xf32> to vector<16x1xf32>
    %cst_102 = arith.constant 3.200000e+01 : f32
    %203 = vector.broadcast %cst_102 : f32 to vector<16x1xf32>
    %204 = arith.divf %202, %203 : vector<16x1xf32>
    %205 = vector.broadcast %204 : vector<16x1xf32> to vector<16x32xf32>
    %206 = arith.subf %196, %205 : vector<16x32xf32>
    %207 = arith.mulf %206, %206 : vector<16x32xf32>
    %cst_103 = arith.constant dense<0.000000e+00> : vector<16xf32>
    %208 = vector.multi_reduction <add>, %207, %cst_103 [1] : vector<16x32xf32> to vector<16xf32>
    %209 = vector.shape_cast %208 : vector<16xf32> to vector<16x1xf32>
    %cst_104 = arith.constant 0.0322580636 : f32
    %210 = vector.broadcast %cst_104 : f32 to vector<16x1xf32>
    %211 = arith.mulf %209, %210 : vector<16x1xf32>
    %212 = math.sqrt %211 : vector<16x1xf32>
    %cst_105 = arith.constant 9.99999997E-7 : f32
    %213 = vector.broadcast %cst_105 : f32 to vector<16x1xf32>
    %214 = arith.addf %212, %213 : vector<16x1xf32>
    %215 = tpu.reciprocal %214 : vector<16x1xf32> -> vector<16x1xf32>
    %216 = vector.broadcast %215 : vector<16x1xf32> to vector<16x32xf32>
    %217 = arith.mulf %206, %216 : vector<16x32xf32>
    %218 = vector.broadcast %198 : vector<1x32xf32> to vector<16x32xf32>
    %219 = arith.mulf %218, %217 : vector<16x32xf32>
    %220 = vector.broadcast %200 : vector<1x32xf32> to vector<16x32xf32>
    %221 = arith.addf %219, %220 : vector<16x32xf32>
    %222 = arith.truncf %221 : vector<16x32xf32> to vector<16x32xbf16>
    %c0_106 = arith.constant 0 : index
    %c0_107 = arith.constant 0 : index
    %c0_108 = arith.constant 0 : index
    %223 = vector.load %arg28[%c0_106, %c0_107, %c0_108] : memref<1x32x64xbf16, #tpu.memory_space<vmem>>, vector<1x32x64xbf16>
    %224 = vector.shape_cast %223 : vector<1x32x64xbf16> to vector<32x64xbf16>
    %cst_109 = arith.constant dense<0.000000e+00> : vector<16x64xf32>
    %225 = tpu.matmul %222, %224, %cst_109 {dimension_numbers = #tpu.dot_dimension_numbers<[1], [0], [0], [1], [0, 0, 1, 1], [], []>} : vector<16x32xbf16>, vector<32x64xbf16>, vector<16x64xf32> -> vector<16x64xf32>
    %c0_110 = arith.constant 0 : index
    %c0_111 = arith.constant 0 : index
    %c0_112 = arith.constant 0 : index
    %226 = vector.load %arg29[%c0_110, %c0_111, %c0_112] : memref<1x1x64xf32, #tpu.memory_space<vmem>>, vector<1x1x64xf32>
    %227 = vector.shape_cast %226 : vector<1x1x64xf32> to vector<1x64xf32>
    %228 = vector.broadcast %227 : vector<1x64xf32> to vector<16x64xf32>
    %229 = arith.addf %225, %228 : vector<16x64xf32>
    %cst_113 = arith.constant 0.000000e+00 : f32
    %230 = vector.broadcast %cst_113 : f32 to vector<16x64xf32>
    %231 = arith.maximumf %229, %230 : vector<16x64xf32>
    %232 = arith.truncf %231 : vector<16x64xf32> to vector<16x64xbf16>
    %c0_114 = arith.constant 0 : index
    %c0_115 = arith.constant 0 : index
    %c0_116 = arith.constant 0 : index
    %233 = vector.load %arg30[%c0_114, %c0_115, %c0_116] : memref<1x64x32xbf16, #tpu.memory_space<vmem>>, vector<1x64x32xbf16>
    %234 = vector.shape_cast %233 : vector<1x64x32xbf16> to vector<64x32xbf16>
    %cst_117 = arith.constant dense<0.000000e+00> : vector<16x32xf32>
    %235 = tpu.matmul %232, %234, %cst_117 {dimension_numbers = #tpu.dot_dimension_numbers<[1], [0], [0], [1], [0, 0, 1, 1], [], []>} : vector<16x64xbf16>, vector<64x32xbf16>, vector<16x32xf32> -> vector<16x32xf32>
    %236 = arith.addf %196, %235 : vector<16x32xf32>
    %c0_118 = arith.constant 0 : index
    %c0_119 = arith.constant 0 : index
    %c0_120 = arith.constant 0 : index
    %237 = vector.load %arg31[%c0_118, %c0_119, %c0_120] : memref<1x1x32xf32, #tpu.memory_space<vmem>>, vector<1x1x32xf32>
    %238 = vector.shape_cast %237 : vector<1x1x32xf32> to vector<1x32xf32>
    %239 = vector.broadcast %238 : vector<1x32xf32> to vector<16x32xf32>
    %240 = arith.addf %236, %239 : vector<16x32xf32>
    %c0_121 = arith.constant 0 : index
    %c0_122 = arith.constant 0 : index
    %241 = vector.load %arg35[%c0_121, %c0_122] : memref<16x32xf32, #tpu.memory_space<vmem>>, vector<16x32xf32>
    tpu.vector_store %arg35[%c0_121, %c0_122], %240 {strides = array<i32>} : memref<16x32xf32, #tpu.memory_space<vmem>>, vector<16x32xf32>,
    %c1_i32 = arith.constant 1 : i32
    %242 = arith.cmpi eq, %arg0, %c1_i32 : i32
    %243 = arith.extui %242 : i1 to i32
    %c0_i32_123 = arith.constant 0 : i32
    %244 = arith.cmpi ne, %243, %c0_i32_123 : i32
    scf.if %244 {
      %c0_124 = arith.constant 0 : index
      %c0_125 = arith.constant 0 : index
      %245 = vector.load %arg32[%c0_124, %c0_125] : memref<1x32xf32, #tpu.memory_space<vmem>>, vector<1x32xf32>
      %c0_126 = arith.constant 0 : index
      %c0_127 = arith.constant 0 : index
      %246 = vector.load %arg33[%c0_126, %c0_127] : memref<1x32xf32, #tpu.memory_space<vmem>>, vector<1x32xf32>
      %cst_128 = arith.constant dense<0.000000e+00> : vector<16xf32>
      %247 = vector.multi_reduction <add>, %240, %cst_128 [1] : vector<16x32xf32> to vector<16xf32>
      %248 = vector.shape_cast %247 : vector<16xf32> to vector<16x1xf32>
      %cst_129 = arith.constant 3.200000e+01 : f32
      %249 = vector.broadcast %cst_129 : f32 to vector<16x1xf32>
      %250 = arith.divf %248, %249 : vector<16x1xf32>
      %251 = vector.broadcast %250 : vector<16x1xf32> to vector<16x32xf32>
      %252 = arith.subf %240, %251 : vector<16x32xf32>
      %253 = arith.mulf %252, %252 : vector<16x32xf32>
      %cst_130 = arith.constant dense<0.000000e+00> : vector<16xf32>
      %254 = vector.multi_reduction <add>, %253, %cst_130 [1] : vector<16x32xf32> to vector<16xf32>
      %255 = vector.shape_cast %254 : vector<16xf32> to vector<16x1xf32>
      %cst_131 = arith.constant 0.0322580636 : f32
      %256 = vector.broadcast %cst_131 : f32 to vector<16x1xf32>
      %257 = arith.mulf %255, %256 : vector<16x1xf32>
      %258 = math.sqrt %257 : vector<16x1xf32>
      %cst_132 = arith.constant 9.99999997E-7 : f32
      %259 = vector.broadcast %cst_132 : f32 to vector<16x1xf32>
      %260 = arith.addf %258, %259 : vector<16x1xf32>
      %261 = tpu.reciprocal %260 : vector<16x1xf32> -> vector<16x1xf32>
      %262 = vector.broadcast %261 : vector<16x1xf32> to vector<16x32xf32>
      %263 = arith.mulf %252, %262 : vector<16x32xf32>
      %264 = vector.broadcast %245 : vector<1x32xf32> to vector<16x32xf32>
      %265 = arith.mulf %264, %263 : vector<16x32xf32>
      %266 = vector.broadcast %246 : vector<1x32xf32> to vector<16x32xf32>
      %267 = arith.addf %265, %266 : vector<16x32xf32>
      %c0_133 = arith.constant 0 : index
      %c0_134 = arith.constant 0 : index
      %268 = vector.load %arg34[%c0_133, %c0_134] : memref<16x32xf32, #tpu.memory_space<vmem>>, vector<16x32xf32>
      tpu.vector_store %arg34[%c0_133, %c0_134], %267 {strides = array<i32>} : memref<16x32xf32, #tpu.memory_space<vmem>>, vector<16x32xf32>,
    } else {
    }
    return
  }
  func.func @transform_0(%arg0: i32) -> (i32, i32) {
    %c0_i32 = arith.constant 0 : i32
    %c0_i32_0 = arith.constant 0 : i32
    %c0_i32_1 = arith.constant 0 : i32
    return %c0_i32, %c0_i32_0 : i32, i32
  }
  func.func @transform_1(%arg0: i32) -> (i32, i32) {
    %c0_i32 = arith.constant 0 : i32
    %c0_i32_0 = arith.constant 0 : i32
    %c0_i32_1 = arith.constant 0 : i32
    return %c0_i32, %c0_i32_0 : i32, i32
  }
  func.func @transform_2(%arg0: i32) -> (i32, i32) {
    %c0_i32 = arith.constant 0 : i32
    %c0_i32_0 = arith.constant 0 : i32
    %c0_i32_1 = arith.constant 0 : i32
    return %c0_i32, %c0_i32_0 : i32, i32
  }
  func.func @transform_3(%arg0: i32) -> (i32, i32) {
    %c0_i32 = arith.constant 0 : i32
    %c0_i32_0 = arith.constant 0 : i32
    %c0_i32_1 = arith.constant 0 : i32
    return %c0_i32, %c0_i32_0 : i32, i32
  }
  func.func @transform_4(%arg0: i32) -> (i32, i32) {
    %c0_i32 = arith.constant 0 : i32
    %c0_i32_0 = arith.constant 0 : i32
    %c0_i32_1 = arith.constant 0 : i32
    return %c0_i32, %c0_i32_0 : i32, i32
  }
  func.func @transform_5(%arg0: i32) -> (i32, i32, i32) {
    %c0_i32 = arith.constant 0 : i32
    %c0_i32_0 = arith.constant 0 : i32
    %c0_i32_1 = arith.constant 0 : i32
    return %arg0, %c0_i32, %c0_i32_0 : i32, i32, i32
  }
  func.func @transform_6(%arg0: i32) -> (i32, i32, i32) {
    %c0_i32 = arith.constant 0 : i32
    %c0_i32_0 = arith.constant 0 : i32
    %c0_i32_1 = arith.constant 0 : i32
    return %arg0, %c0_i32, %c0_i32_0 : i32, i32, i32
  }
  func.func @transform_7(%arg0: i32) -> (i32, i32, i32) {
    %c0_i32 = arith.constant 0 : i32
    %c0_i32_0 = arith.constant 0 : i32
    %c0_i32_1 = arith.constant 0 : i32
    return %arg0, %c0_i32, %c0_i32_0 : i32, i32, i32
  }
  func.func @transform_8(%arg0: i32) -> (i32, i32, i32) {
    %c0_i32 = arith.constant 0 : i32
    %c0_i32_0 = arith.constant 0 : i32
    %c0_i32_1 = arith.constant 0 : i32
    return %arg0, %c0_i32, %c0_i32_0 : i32, i32, i32
  }
  func.func @transform_9(%arg0: i32) -> (i32, i32, i32) {
    %c0_i32 = arith.constant 0 : i32
    %c0_i32_0 = arith.constant 0 : i32
    %c0_i32_1 = arith.constant 0 : i32
    return %arg0, %c0_i32, %c0_i32_0 : i32, i32, i32
  }
  func.func @transform_10(%arg0: i32) -> (i32, i32, i32) {
    %c0_i32 = arith.constant 0 : i32
    %c0_i32_0 = arith.constant 0 : i32
    %c0_i32_1 = arith.constant 0 : i32
    return %arg0, %c0_i32, %c0_i32_0 : i32, i32, i32
  }
  func.func @transform_11(%arg0: i32) -> (i32, i32, i32) {
    %c0_i32 = arith.constant 0 : i32
    %c0_i32_0 = arith.constant 0 : i32
    %c0_i32_1 = arith.constant 0 : i32
    return %arg0, %c0_i32, %c0_i32_0 : i32, i32, i32
  }
  func.func @transform_12(%arg0: i32) -> (i32, i32, i32) {
    %c0_i32 = arith.constant 0 : i32
    %c0_i32_0 = arith.constant 0 : i32
    %c0_i32_1 = arith.constant 0 : i32
    return %arg0, %c0_i32, %c0_i32_0 : i32, i32, i32
  }
  func.func @transform_13(%arg0: i32) -> (i32, i32, i32) {
    %c0_i32 = arith.constant 0 : i32
    %c0_i32_0 = arith.constant 0 : i32
    %c0_i32_1 = arith.constant 0 : i32
    return %arg0, %c0_i32, %c0_i32_0 : i32, i32, i32
  }
  func.func @transform_14(%arg0: i32) -> (i32, i32, i32) {
    %c0_i32 = arith.constant 0 : i32
    %c0_i32_0 = arith.constant 0 : i32
    %c0_i32_1 = arith.constant 0 : i32
    return %arg0, %c0_i32, %c0_i32_0 : i32, i32, i32
  }
  func.func @transform_15(%arg0: i32) -> (i32, i32, i32) {
    %c0_i32 = arith.constant 0 : i32
    %c0_i32_0 = arith.constant 0 : i32
    %c0_i32_1 = arith.constant 0 : i32
    return %arg0, %c0_i32, %c0_i32_0 : i32, i32, i32
  }
  func.func @transform_16(%arg0: i32) -> (i32, i32, i32) {
    %c0_i32 = arith.constant 0 : i32
    %c0_i32_0 = arith.constant 0 : i32
    %c0_i32_1 = arith.constant 0 : i32
    return %arg0, %c0_i32, %c0_i32_0 : i32, i32, i32
  }
  func.func @transform_17(%arg0: i32) -> (i32, i32, i32) {
    %c0_i32 = arith.constant 0 : i32
    %c0_i32_0 = arith.constant 0 : i32
    %c0_i32_1 = arith.constant 0 : i32
    return %arg0, %c0_i32, %c0_i32_0 : i32, i32, i32
  }
  func.func @transform_18(%arg0: i32) -> (i32, i32, i32) {
    %c0_i32 = arith.constant 0 : i32
    %c0_i32_0 = arith.constant 0 : i32
    %c0_i32_1 = arith.constant 0 : i32
    return %arg0, %c0_i32, %c0_i32_0 : i32, i32, i32
  }
  func.func @transform_19(%arg0: i32) -> (i32, i32, i32) {
    %c0_i32 = arith.constant 0 : i32
    %c0_i32_0 = arith.constant 0 : i32
    %c0_i32_1 = arith.constant 0 : i32
    return %arg0, %c0_i32, %c0_i32_0 : i32, i32, i32
  }
  func.func @transform_20(%arg0: i32) -> (i32, i32, i32) {
    %c0_i32 = arith.constant 0 : i32
    %c0_i32_0 = arith.constant 0 : i32
    %c0_i32_1 = arith.constant 0 : i32
    return %arg0, %c0_i32, %c0_i32_0 : i32, i32, i32
  }
  func.func @transform_21(%arg0: i32) -> (i32, i32, i32) {
    %c0_i32 = arith.constant 0 : i32
    %c0_i32_0 = arith.constant 0 : i32
    %c0_i32_1 = arith.constant 0 : i32
    return %arg0, %c0_i32, %c0_i32_0 : i32, i32, i32
  }
  func.func @transform_22(%arg0: i32) -> (i32, i32, i32) {
    %c0_i32 = arith.constant 0 : i32
    %c0_i32_0 = arith.constant 0 : i32
    %c0_i32_1 = arith.constant 0 : i32
    return %arg0, %c0_i32, %c0_i32_0 : i32, i32, i32
  }
  func.func @transform_23(%arg0: i32) -> (i32, i32, i32) {
    %c0_i32 = arith.constant 0 : i32
    %c0_i32_0 = arith.constant 0 : i32
    %c0_i32_1 = arith.constant 0 : i32
    return %arg0, %c0_i32, %c0_i32_0 : i32, i32, i32
  }
  func.func @transform_24(%arg0: i32) -> (i32, i32, i32) {
    %c0_i32 = arith.constant 0 : i32
    %c0_i32_0 = arith.constant 0 : i32
    %c0_i32_1 = arith.constant 0 : i32
    return %arg0, %c0_i32, %c0_i32_0 : i32, i32, i32
  }
  func.func @transform_25(%arg0: i32) -> (i32, i32, i32) {
    %c0_i32 = arith.constant 0 : i32
    %c0_i32_0 = arith.constant 0 : i32
    %c0_i32_1 = arith.constant 0 : i32
    return %arg0, %c0_i32, %c0_i32_0 : i32, i32, i32
  }
  func.func @transform_26(%arg0: i32) -> (i32, i32, i32) {
    %c0_i32 = arith.constant 0 : i32
    %c0_i32_0 = arith.constant 0 : i32
    %c0_i32_1 = arith.constant 0 : i32
    return %arg0, %c0_i32, %c0_i32_0 : i32, i32, i32
  }
  func.func @transform_27(%arg0: i32) -> (i32, i32, i32) {
    %c0_i32 = arith.constant 0 : i32
    %c0_i32_0 = arith.constant 0 : i32
    %c0_i32_1 = arith.constant 0 : i32
    return %arg0, %c0_i32, %c0_i32_0 : i32, i32, i32
  }
  func.func @transform_28(%arg0: i32) -> (i32, i32, i32) {
    %c0_i32 = arith.constant 0 : i32
    %c0_i32_0 = arith.constant 0 : i32
    %c0_i32_1 = arith.constant 0 : i32
    return %arg0, %c0_i32, %c0_i32_0 : i32, i32, i32
  }
  func.func @transform_29(%arg0: i32) -> (i32, i32, i32) {
    %c0_i32 = arith.constant 0 : i32
    %c0_i32_0 = arith.constant 0 : i32
    %c0_i32_1 = arith.constant 0 : i32
    return %arg0, %c0_i32, %c0_i32_0 : i32, i32, i32
  }
  func.func @transform_30(%arg0: i32) -> (i32, i32, i32) {
    %c0_i32 = arith.constant 0 : i32
    %c0_i32_0 = arith.constant 0 : i32
    %c0_i32_1 = arith.constant 0 : i32
    return %arg0, %c0_i32, %c0_i32_0 : i32, i32, i32
  }
  func.func @transform_31(%arg0: i32) -> (i32, i32) {
    %c0_i32 = arith.constant 0 : i32
    %c0_i32_0 = arith.constant 0 : i32
    %c0_i32_1 = arith.constant 0 : i32
    return %c0_i32, %c0_i32_0 : i32, i32
  }
  func.func @transform_32(%arg0: i32) -> (i32, i32) {
    %c0_i32 = arith.constant 0 : i32
    %c0_i32_0 = arith.constant 0 : i32
    %c0_i32_1 = arith.constant 0 : i32
    return %c0_i32, %c0_i32_0 : i32, i32
  }
  func.func @transform_33(%arg0: i32) -> (i32, i32) {
    %c0_i32 = arith.constant 0 : i32
    %c0_i32_0 = arith.constant 0 : i32
    %c0_i32_1 = arith.constant 0 : i32
    return %c0_i32, %c0_i32_0 : i32, i32
  }
}

</mosaic_0001>

<bundles_post_ra>
// kernel: decoder_forward.1
= control target key start
LH: loop header
LB: loop body
LE: loop exit
PB: predicated region body
PF: predicated region fallthrough
CT: control target
= control target key end

     0   :  { %s3667_s6 = smov 1   ;;  %s3668_s10 = smov 2   ;;  %s4324_s0 = inlined_call_operand.smem [shape: u32[34], index: -1, kind: input, shape index: {}] }
   0x1   :  { %s3717_s5 = sld [smem:[%s4324_s0]]   ;;  %s3669_s14 = smov 3  }
   0x2   :  { %s3722_s9 = sld [smem:[%s4324_s0 + %s3667_s6]]   ;;  %s3670_s18 = smov 4  }
   0x3   :  { %s3727_s13 = sld [smem:[%s4324_s0 + %s3668_s10]]   ;;  %s3671_s22 = smov 5  }
   0x4   :  { %s3732_s17 = sld [smem:[%s4324_s0 + %s3669_s14]]   ;;  %s3672_s26 = smov 6  }
   0x5   :  { %s3737_s21 = sld [smem:[%s4324_s0 + %s3670_s18]]   ;;  %s3673_s30 = smov 7  }
   0x6   :  { %s3742_s25 = sld [smem:[%s4324_s0 + %s3671_s22]]   ;;  %s3674_s4 = smov 8  }
   0x7   :  { %4337 = sst [smem:[#allocation6_spill]] %s3717_s5  ;;  %s3675_s10 = smov 9  }
   0x8   :  { %4338 = sst [smem:[#allocation7_spill]] %s3722_s9  ;;  %s3676_s15 = smov 10  }
   0x9   :  { %4339 = sst [smem:[#allocation8_spill]] %s3727_s13  ;;  %s3677_s20 = smov 11  }
   0xa   :  { %4340 = sst [smem:[#allocation9_spill]] %s3732_s17  ;;  %s3679_s1 = smov 13  }
   0xb   :  { %4341 = sst [smem:[#allocation10_spill]] %s3737_s21  ;;  %s3680_s7 = smov 14  }
   0xc   :  { %4342 = sst [smem:[#allocation11_spill]] %s3742_s25  ;;  %s3682_s22 = smov 16  }
   0xd   :  { %s3747_s29 = sld [smem:[%s4324_s0 + %s3672_s26]]   ;;  %s3678_s26 = smov 12  }
   0xe   :  { %s3752_s3 = sld [smem:[%s4324_s0 + %s3673_s30]]   ;;  %s3683_s28 = smov 17  }
   0xf   :  { %s3757_s8 = sld [smem:[%s4324_s0 + %s3674_s4]]  }
  0x10   :  { %s3762_s14 = sld [smem:[%s4324_s0 + %s3675_s10]]  }
  0x11   :  { %s3767_s19 = sld [smem:[%s4324_s0 + %s3676_s15]]   ;;  %s3681_s15 = smov 15  }
  0x12   :  { %s3772_s24 = sld [smem:[%s4324_s0 + %s3677_s20]]  }
  0x13   :  { %4343 = sst [smem:[#allocation12_spill]] %s3747_s29 }
  0x14   :  { %4344 = sst [smem:[#allocation13_spill]] %s3752_s3 }
  0x15   :  { %4345 = sst [smem:[#allocation14_spill]] %s3757_s8 }
  0x16   :  { %4346 = sst [smem:[#allocation15_spill]] %s3762_s14 }
  0x17   :  { %4347 = sst [smem:[#allocation16_spill]] %s3767_s19 }
  0x18   :  { %4348 = sst [smem:[#allocation17_spill]] %s3772_s24 }
  0x19   :  { %s3777_s30 = sld [smem:[%s4324_s0 + %s3678_s26]]  }
  0x1a   :  { %s3782_s6 = sld [smem:[%s4324_s0 + %s3679_s1]]  }
  0x1b   :  { %s3787_s12 = sld [smem:[%s4324_s0 + %s3680_s7]]   ;;  %s3684_s7 = smov 18  }
  0x1c   :  { %s3792_s20 = sld [smem:[%s4324_s0 + %s3681_s15]]   ;;  %s3685_s15 = smov 19  }
  0x1d   :  { %s3797_s27 = sld [smem:[%s4324_s0 + %s3682_s22]]   ;;  %s3686_s22 = smov 20  }
  0x1e   :  { %s3802_s4 = sld [smem:[%s4324_s0 + %s3683_s28]]   ;;  %s3687_s28 = smov 21  }
  0x1f   :  { %4349 = sst [smem:[#allocation18_spill]] %s3777_s30 }
  0x20   :  { %4350 = sst [smem:[#allocation19_spill]] %s3782_s6 }
  0x21   :  { %4351 = sst [smem:[#allocation20_spill]] %s3787_s12 }
  0x22   :  { %4352 = sst [smem:[#allocation21_spill]] %s3792_s20 }
  0x23   :  { %4353 = sst [smem:[#allocation22_spill]] %s3797_s27 }
  0x24   :  { %4354 = sst [smem:[#allocation23_spill]] %s3802_s4 }
  0x25   :  { %s3807_s21 = sld [smem:[%s4324_s0 + %s3684_s7]]   ;;  %s3688_s7 = smov 22  }
  0x26   :  { %s3812_s17 = sld [smem:[%s4324_s0 + %s3685_s15]]   ;;  %s3689_s15 = smov 23  }
  0x27   :  { %s3817_s13 = sld [smem:[%s4324_s0 + %s3686_s22]]   ;;  %s3690_s22 = smov 24  }
  0x28   :  { %s3822_s9 = sld [smem:[%s4324_s0 + %s3687_s28]]   ;;  %s3691_s28 = smov 25  }
  0x29   :  { %s3827_s5 = sld [smem:[%s4324_s0 + %s3688_s7]]   ;;  %s3692_s7 = smov 26  }
  0x2c   :  { %4355 = sst [smem:[#allocation24_spill]] %s3812_s17 }
  0x2d   :  { %4356 = sst [smem:[#allocation25_spill]] %s3817_s13 }
  0x2e   :  { %4357 = sst [smem:[#allocation26_spill]] %s3822_s9 }
  0x2f   :  { %4358 = sst [smem:[#allocation27_spill]] %s3827_s5 }
  0x30   :  { %s3832_s17 = sld [smem:[%s4324_s0 + %s3689_s15]]   ;;  %s3693_s15 = smov 27  }
  0x31   :  { %s3837_s13 = sld [smem:[%s4324_s0 + %s3690_s22]]   ;;  %s3694_s22 = smov 28  }
  0x32   :  { %s3842_s9 = sld [smem:[%s4324_s0 + %s3691_s28]]   ;;  %s3695_s28 = smov 29  }
  0x33   :  { %s3847_s5 = sld [smem:[%s4324_s0 + %s3692_s7]]   ;;  %s3696_s7 = smov 30  }
  0x36   :  { %4359 = sst [smem:[#allocation28_spill]] %s3832_s17 }
  0x37   :  { %4360 = sst [smem:[#allocation29_spill]] %s3837_s13 }
  0x38   :  { %4361 = sst [smem:[#allocation30_spill]] %s3842_s9 }
  0x39   :  { %4362 = sst [smem:[#allocation31_spill]] %s3847_s5 }
  0x3a   :  { %s3852_s17 = sld [smem:[%s4324_s0 + %s3693_s15]]   ;;  %s3697_s15 = smov 31  }
  0x3b   :  { %s3857_s13 = sld [smem:[%s4324_s0 + %s3694_s22]]   ;;  %s3698_s22 = smov 32  }
  0x3c   :  { %s3862_s9 = sld [smem:[%s4324_s0 + %s3695_s28]]   ;;  %s3699_s28 = smov 33  }
  0x3d   :  { %s3867_s5 = sld [smem:[%s4324_s0 + %s3696_s7]]  }
  0x40   :  { %4363 = sst [smem:[#allocation32_spill]] %s3852_s17 }
  0x41   :  { %4364 = sst [smem:[#allocation33_spill]] %s3857_s13 }
  0x42   :  { %4365 = sst [smem:[#allocation34_spill]] %s3862_s9 }
  0x43   :  { %4366 = sst [smem:[#allocation35_spill]] %s3867_s5 }
  0x44   :  { %s3872_s17 = sld [smem:[%s4324_s0 + %s3697_s15]]  }
  0x45   :  { %s3877_s13 = sld [smem:[%s4324_s0 + %s3698_s22]]  }
  0x46   :  { %s3882_s9 = sld [smem:[%s4324_s0 + %s3699_s28]]  }
  0x4a   :  { %4367 = sst [smem:[#allocation36_spill]] %s3872_s17 }
  0x4b   :  { %4368 = sst [smem:[#allocation37_spill]] %s3877_s13 }
  0x4c   :  { %4369 = sst [smem:[#allocation38_spill]] %s3882_s9 }
  0x4d   :  { %72 = vsyncpa [#allocation4], 0  ;;  %s3884_s7 = smov 0  }
  0x4e LB: > { %4370 = sst [smem:[#allocation39_spill]] %s3665_s7  ;;  %s3890_s10 = sadd.s32 4294967295, %s3665_s7   ;;  %s3665_s7 = sphi %s3884_s7, %s78_s7  }
  0x4f   : > { %4371 = sst [smem:[#allocation40_spill]] %s3890_s10  ;;  %p3157_p0 = scmp.ge.s32.totalorder %s3665_s7, 1 }
  0x50   : > { %p1135_p1 = scmp.lt.s32.totalorder %s3665_s7, 3 }
  0x52   : > { %p1136_p2 = pnand %p3157_p0, %p1135_p1 }
  0x54   : > { %1139 = sbr.rel (%p1136_p2) target bundleno = 3831 (0xef7), region = 152 }
  0x59   : > { %s4375_s3 = sld [smem:[#allocation13_spill]]  ;;  %p1307_p3 = scmp.lt.s32.totalorder %s3890_s10, 1 }
  0x5a   : > { %s4376_s14 = sld [smem:[#allocation15_spill]] }
  0x5b   : > { %s4378_s24 = sld [smem:[#allocation17_spill]] }
  0x5c   : > { %s4380_s6 = sld [smem:[#allocation19_spill]] }
  0x5d   : > { %s4384_s4 = sld [smem:[#allocation23_spill]] }
  0x5e   : > { %s3896_s0 = scalar_select %p1307_p3, %s3890_s10, 1 }
  0x5f   : > { %s4385_s11 = sld [smem:[#allocation24_spill]] }
  0x60   : > { %s4386_s16 = sld [smem:[#allocation25_spill]]  ;;  %s3302_s23 = sshll.u32 %s3896_s0, 4 }
  0x61   : > { %s4387_s22 = sld [smem:[#allocation26_spill]]  ;;  %s3906_s2 = scalar_lea.vmem %s4375_s3, %s3302_s23 }
  0x62   : > { %s4388_s26 = sld [smem:[#allocation27_spill]]  ;;  %s3909_s9 = scalar_lea.vmem %s4376_s14, %s3302_s23 }
  0x63   : > { %s4389_s1 = sld [smem:[#allocation28_spill]]  ;;  %s3914_s25 = scalar_lea.vmem %s4378_s24, %s3302_s23 }
  0x64   : > { %4390 = sst [smem:[#allocation41_spill]] %s3906_s2  ;;  %s3919_s5 = scalar_lea.vmem %s4380_s6, %s3302_s23 }
  0x65   : > { %s4391_s7 = sld [smem:[#allocation29_spill]]  ;;  %s3928_s2 = scalar_lea.vmem %s4384_s4, %s3302_s23 }
  0x66   : > { %4392 = sst [smem:[#allocation42_spill]] %s3909_s9  ;;  %s1358_s17 = scalar_lea.vmem %s3807_s21, %s3896_s0 }
  0x67   : > { %s4393_s13 = sld [smem:[#allocation30_spill]]  ;;  %s3933_s19 = scalar_lea.vmem %s4385_s11, %s3302_s23 }
  0x68   : > { %s4394_s15 = sld [smem:[#allocation31_spill]]  ;;  %s1366_s24 = scalar_lea.vmem %s4386_s16, %s3896_s0 }
  0x69   : > { %4395 = sst [smem:[#allocation43_spill]] %s3914_s25  ;;  %s3938_s25 = scalar_lea.vmem %s4387_s22, %s3302_s23 }
  0x6a   : > { %s4396_s18 = sld [smem:[#allocation32_spill]]  ;;  %s1374_s29 = scalar_lea.vmem %s4388_s26, %s3896_s0 }
  0x6b   : > { %s4397_s10 = sld [smem:[#allocation33_spill]]  ;;  %s3943_s30 = scalar_lea.vmem %s4389_s1, %s3302_s23 }
  0x6c   : > { %4398 = sst [smem:[#allocation44_spill]] %s3919_s5  ;;  %s1382_s6 = scalar_lea.vmem %s4391_s7, %s3896_s0 }
  0x6d   : > { %s4399_s3 = sld [smem:[#allocation34_spill]]  ;;  %s1385_s5 = scalar_lea.vmem %s4393_s13, %s3896_s0 }
  0x6e   : > { %s4400_s14 = sld [smem:[#allocation35_spill]]  ;;  %s1388_s12 = scalar_lea.vmem %s4394_s15, %s3896_s0 }
  0x6f   : > { %s3311_s20 = sshll.u32 %s3896_s0, 5  ;;  %s4401_s27 = sld [smem:[#allocation40_spill]] }
  0x70   : > { %s3952_s28 = scalar_lea.vmem %s4396_s18, %s3302_s23 }
  0x71   : > { %s1396_s8 = scalar_lea.vmem %s4397_s10, %s3896_s0 }
  0x73   : > { %s3958_s9 = scalar_lea.vmem %s4399_s3, %s3311_s20 }
  0x74   : > { %s1404_s4 = scalar_lea.vmem %s4400_s14, %s3896_s0 }
  0x75   : > { %p3178_p4 = scmp.ne.s32.totalorder %s4401_s27, 0 }
  0x76   : > { %s4402_s11 = sld [smem:[#allocation6_spill]] (!%p3178_p4) }
  0x77   : > { %1409 = sbr.rel (%p3178_p4) target bundleno = 131 (0x83), region = 156  ;;  %s4403_s16 = sld [smem:[#allocation7_spill]] (!%p3178_p4) }
  0x7c   : > { %v1410_v0 = vld [vmem:[%s4402_s11] sm:$0xff]  ;;  %v1411_v2 = vld [vmem:[%s4402_s11 + $0x8] sm:$0xff]  ;;  %vm1418_vm0 = vcmask 261120  }
  0x7d   : > { %v1414_v1 = vld [vmem:[%s4403_s16] sm:$0xff]  ;;  %v1412_v3 = vmul.f32 5.656854, %v1410_v0  ;;  %v1413_v4 = vmul.f32 5.656854, %v1411_v2  ;;  %v1415_v5 = vld [vmem:[%s4403_s16 + $0x8] sm:$0xff] }
  0x7f   : > { %v1416_v6 = vadd.f32 %v1414_v1, %v1412_v3  ;;  %v1417_v7 = vadd.f32 %v1415_v5, %v1413_v4 }
  0x81   : > { %1419 = vst.msk [vmem:[#allocation2] sm:$0xff] %vm1418_vm0, %v1416_v6 }
  0x82   : > { %1420 = vst.msk [vmem:[#allocation2 + $0x8] sm:$0xff] %vm1418_vm0, %v1417_v7 }
  0x83 PF: > { %vm1425_vm1 = vcmask 261120   ;;  %v3700_v12 = vmov 32.0   ;;  %s4404_s13 = sld [smem:[#allocation41_spill]]  ;;  %vm1710_vm15 = vcmask 64512   ;;  %vm1780_vm0 = vcmask 523264  }
  0x84   : > { %3527 = vrcp.f32 %v3700_v12  ;;  %s4405_s3 = sld [smem:[#allocation42_spill]] }
  0x85   : > { %s4406_s14 = sld [smem:[#allocation43_spill]] }
  0x86   : > { %s4407_s20 = sld [smem:[#allocation11_spill]] }
  0x87   : > { %s4408_s27 = sld [smem:[#allocation12_spill]] }
  0x88   : > { %v3967_v8 = vld [vmem:[#allocation2] sm:$0xff]  ;;  %s4410_s10 = sld [smem:[#allocation14_spill]] }
  0x89   : > { %v1426_v9 = vsel %vm1425_vm1, %v3967_v8, 0.0  ;;  %v3971_v10 = vld [vmem:[#allocation2 + $0x8] sm:$0xff]  ;;  %v3312_v33 = vld [vmem:[%s4404_s13] sm:$0xff]  ;;  %s4412_s18 = sld [smem:[#allocation16_spill]] }
  0x8a   : > { %1427 = vadd.xlane.f32.xlu0 %v1426_v9  ;;  %v1429_v11 = vsel %vm1425_vm1, %v3971_v10, 0.0  ;;  %v3528_v13 = vpop.eup %3527  ;;  %v3313_v29 = vld [vmem:[%s4404_s13 + $0x8] sm:$0xff]  ;;  %v3314_v34 = vld [vmem:[%s4405_s3] sm:$0xff]  ;;  %s4413_s22 = sld [smem:[#allocation18_spill]]  ;;  %s3701_s13 = smov 120  }
  0x8b   : > { %v1433_v14 = vmul.f32 32.0, %v3528_v13  ;;  %vm1437_vm2 = vweird.f32 %v3528_v13  ;;  %v3315_v30 = vld [vmem:[%s4405_s3 + $0x8] sm:$0xff]  ;;  %1572 = vmatpush.bf16.msra.mxu0 %v3313_v29  ;;  %v3316_v36 = vld [vmem:[%s4406_s14] sm:$0xff]  ;;  %s3702_s3 = smov 104  }
  0x8c   : > { %v3317_v31 = vld [vmem:[%s4406_s14 + $0x8] sm:$0xff]  ;;  %1601 = vmatpush.bf16.msra.mxu3 %v3315_v30  ;;  %s4409_s7 = scalar_lea.vmem %s4407_s20, %s3896_s0  ;;  %s3703_s14 = smov 112  }
  0x8d   : > { %v1434_v15 = vsub.f32 1.0, %v1433_v14  ;;  %1630 = vmatpush.bf16.msra.mxu2 %v3317_v31  ;;  %s4411_s15 = scalar_lea.vmem %s4408_s27, %s3896_s0  ;;  %s4417_s20 = sld [smem:[#allocation8_spill]] }
  0x8e   : > { %s4414_s23 = scalar_lea.vmem %s4410_s10, %s3896_s0  ;;  %s4418_s27 = sld [smem:[#allocation44_spill]] }
  0x8f   : > { %v1435_v16 = vmul.f32 %v3528_v13, %v1434_v15  ;;  %1573 = vmatpush.bf16.msra.mxu0 %v3312_v33  ;;  %s4415_s26 = scalar_lea.vmem %s4412_s18, %s3896_s0  ;;  %s3705_s10 = smov 16  }
  0x90   : > { %1602 = vmatpush.bf16.msra.mxu3 %v3314_v34  ;;  %s4416_s1 = scalar_lea.vmem %s4413_s22, %s3896_s0  ;;  %s4419_s18 = sld [smem:[#allocation9_spill]] }
  0x91   : > { %v1436_v17 = vadd.f32 %v3528_v13, %v1435_v16  ;;  %1631 = vmatpush.bf16.msra.mxu2 %v3316_v36  ;;  %v3514_v36 = vld [vmem:[%s4415_s26] ss:$0 sm:$0xff]  ;;  %s4420_s22 = sld [smem:[#allocation20_spill]] }
  0x92   : > { %1430 = vadd.xlane.f32.xlu0 %v1429_v11 }
  0x93   : > { %v3975_v18 = vsel %vm1437_vm2, %v3528_v13, %v1436_v17  ;;  %v3511_v17 = vld [vmem:[%s4409_s7] ss:$0 sm:$0xff]  ;;  %s3704_s7 = smov 8   ;;  %vm1940_vm2 = vcmask 130048  }
  0x97   : > { %s4422_s26 = scalar_lea.vmem %s4420_s22, %s3896_s0 }
  0xfd   : > { %v1428_v19 = vpop.xlane.xlu0 %1427 }
  0xfe   : > { %v1439_v20 = vmul.f32 %v3975_v18, %v1428_v19 }
 0x100   : > { %v3979_v21 = vsub.f32 %v3967_v8, %v1439_v20 }
 0x102   : > { %v1443_v22 = vmul.f32 %v3979_v21, %v3979_v21 }
 0x104   : > { %v1445_v23 = vsel %vm1425_vm1, %v1443_v22, 0.0 }
 0x105   : > { %1446 = vadd.xlane.f32.xlu1 %v1445_v23  ;;  %v1431_v24 = vpop.xlane.xlu0 %1430 }
 0x106   : > { %v1440_v25 = vmul.f32 %v3975_v18, %v1431_v24 }
 0x108   : > { %v3986_v26 = vsub.f32 %v3971_v10, %v1440_v25  ;;  %v3512_v25 = vld [vmem:[%s4411_s15] ss:$0 sm:$0xff]  ;;  %s3706_s15 = smov 24  }
 0x10a   : > { %v1444_v27 = vmul.f32 %v3986_v26, %v3986_v26 }
 0x10c   : > { %v1448_v28 = vsel %vm1425_vm1, %v1444_v27, 0.0 }
 0x10d   : > { %1449 = vadd.xlane.f32.xlu1 %v1448_v28 }
 0x178   : > { %v1447_v32 = vpop.xlane.xlu1 %1446 }
 0x179   : > { %v1451_v35 = vmul.f32 0.032258064, %v1447_v32 }
 0x17b   : > { %3529 = vrsqrt.f32 %v1451_v35  ;;  %vm1460_vm3 = vcmp.eq.f32.partialorder %v1451_v35, inf  ;;  %v1463_v49 = vand.u32 2147483648, %v1451_v35  ;;  %vm1462_vm4 = vcmp.eq.f32.partialorder %v1451_v35, 0.0 }
 0x180   : > { %v1450_v37 = vpop.xlane.xlu1 %1449 }
 0x181   : > { %v3530_v38 = vpop.eup %3529  ;;  %v1452_v39 = vmul.f32 0.032258064, %v1450_v37 }
 0x182   : > { %v1454_v40 = vmul.f32 %v3530_v38, %v1451_v35 }
 0x183   : > { %3531 = vrsqrt.f32 %v1452_v39  ;;  %vm1472_vm5 = vcmp.eq.f32.partialorder %v1452_v39, inf  ;;  %v1475_v57 = vand.u32 2147483648, %v1452_v39  ;;  %vm1474_vm6 = vcmp.eq.f32.partialorder %v1452_v39, 0.0 }
 0x184   : > { %v1455_v41 = vmul.f32 %v3530_v38, %v1454_v40 }
 0x186   : > { %v1456_v42 = vmul.f32 0.5, %v1455_v41 }
 0x188   : > { %v1457_v43 = vsub.f32 1.5, %v1456_v42 }
 0x189   : > { %v3532_v44 = vpop.eup %3531 }
 0x18a   : > { %v1458_v45 = vmul.f32 %v3530_v38, %v1457_v43  ;;  %v1466_v46 = vmul.f32 %v3532_v44, %v1452_v39 }
 0x18c   : > { %v1459_v47 = vmul.f32 %v1458_v45, %v1451_v35  ;;  %v1467_v48 = vmul.f32 %v3532_v44, %v1466_v46 }
 0x18e   : > { %v1461_v50 = vsel %vm1460_vm3, %v1451_v35, %v1459_v47  ;;  %v1468_v51 = vmul.f32 0.5, %v1467_v48  ;;  %vm1943_vm3 = vcmask 195584  }
 0x18f   : > { %v1464_v52 = vsel %vm1462_vm4, %v1463_v49, %v1461_v50 }
 0x190   : > { %v1469_v53 = vsub.f32 1.5, %v1468_v51  ;;  %v1477_v54 = vadd.f32 1e-06, %v1464_v52 }
 0x192   : > { %v1470_v55 = vmul.f32 %v3532_v44, %v1469_v53  ;;  %3533 = vrcp.f32 %v1477_v54  ;;  %v1490_v1 = vand.u32 2147483648, %v1477_v54  ;;  %vm1484_vm8 = vweird.f32 %v1477_v54 }
 0x193   : > { %v1488_v3 = vand.u32 2147483647, %v1477_v54 }
 0x194   : > { %v1471_v56 = vmul.f32 %v1470_v55, %v1452_v39  ;;  %v1491_v7 = vor.u32 1.1754944e-38, %v1490_v1 }
 0x195   : > { %vm1489_vm10 = vcmp.eq.f32.partialorder %v1488_v3, 8.507059e+37 }
 0x196   : > { %v1473_v58 = vsel %vm1472_vm5, %v1452_v39, %v1471_v56  ;;  %v3515_v39 = vld [vmem:[%s4416_s1] ss:$0 sm:$0xff] }
 0x197   : > { %v1476_v59 = vsel %vm1474_vm6, %v1475_v57, %v1473_v58 }
 0x198   : > { %v3534_v60 = vpop.eup %3533  ;;  %v1478_v61 = vadd.f32 1e-06, %v1476_v59 }
 0x199   : > { %v1480_v62 = vmul.f32 %v3534_v60, %v1477_v54  ;;  %vm1485_vm7 = vweird.f32 %v3534_v60 }
 0x19a   : > { %3535 = vrcp.f32 %v1478_v61  ;;  %vm1486_vm9 = vmor %vm1484_vm8, %vm1485_vm7  ;;  %v1504_v12 = vand.u32 2147483648, %v1478_v61  ;;  %v1502_v14 = vand.u32 2147483647, %v1478_v61  ;;  %vm1498_vm12 = vweird.f32 %v1478_v61 }
 0x19b   : > { %v1481_v63 = vsub.f32 1.0, %v1480_v62 }
 0x19c   : > { %v1505_v19 = vor.u32 1.1754944e-38, %v1504_v12  ;;  %vm1503_vm14 = vcmp.eq.f32.partialorder %v1502_v14, 8.507059e+37 }
 0x19d   : > { %v1482_v0 = vmul.f32 %v3534_v60, %v1481_v63 }
 0x19f   : > { %v1483_v2 = vadd.f32 %v3534_v60, %v1482_v0 }
 0x1a0   : > { %v3536_v4 = vpop.eup %3535 }
 0x1a1   : > { %v1487_v5 = vsel %vm1486_vm9, %v3534_v60, %v1483_v2  ;;  %v1494_v6 = vmul.f32 %v3536_v4, %v1478_v61  ;;  %vm1499_vm11 = vweird.f32 %v3536_v4 }
 0x1a2   : > { %v1492_v11 = vsel %vm1489_vm10, %v1491_v7, %v1487_v5  ;;  %vm1500_vm13 = vmor %vm1498_vm12, %vm1499_vm11 }
 0x1a3   : > { %v1495_v9 = vsub.f32 1.0, %v1494_v6  ;;  %v1507_v16 = vmul.f32 %v1492_v11, %v3979_v21 }
 0x1a5   : > { %v1496_v13 = vmul.f32 %v3536_v4, %v1495_v9  ;;  %v1512_v24 = vmul.f32 %v3511_v17, %v1507_v16  ;;  %v1520_v16 = vld [vmem:[%s4417_s20] sm:$0xff] }
 0x1a7   : > { %v1497_v15 = vadd.f32 %v3536_v4, %v1496_v13  ;;  %v1517_v28 = vadd.f32 %v3512_v25, %v1512_v24 }
 0x1a9   : > { %v1501_v20 = vsel %vm1500_vm13, %v3536_v4, %v1497_v15 }
 0x1aa   : > { %v1506_v22 = vsel %vm1503_vm14, %v1505_v19, %v1501_v20 }
 0x1ab   : > { %v1508_v23 = vmul.f32 %v1506_v22, %v3986_v26  ;;  %v3513_v26 = vld [vmem:[%s4414_s23] ss:$0 sm:$0xff] }
 0x1ad   : > { %v1513_v27 = vmul.f32 %v3511_v17, %v1508_v23  ;;  %v1521_v23 = vld [vmem:[%s4417_s20 + $0x8] sm:$0xff] }
 0x1af   : > { %v1518_v21 = vadd.f32 %v3512_v25, %v1513_v27 }
 0x1b1   : > { %v1519_v29 = vpack.c.bf16 %v1518_v21, %v1517_v28  ;;  %v1522_v21 = vld [vmem:[%s4417_s20 + $0x10] sm:$0xff] }
 0x1b3   : > { %3187 = vmatmul.msk.bf16.vlgmr.msra.gmra.mxu0 %vm1425_vm1, %v1519_v29  ;;  %3196 = vmatmul.msk.bf16.vlgmr.msra.gmra.mxu3 %vm1425_vm1, %v1519_v29 }
 0x1b4   : > { %3205 = vmatmul.msk.bf16.vlgmr.msra.gmra.mxu2 %vm1425_vm1, %v1519_v29 }
 0x230   : > { %v1575_v30 = vpop.f32.mrf.mxu0 }
 0x231   : > { %v1576_v34 = vadd.f32 %v3513_v26, %v1575_v30 }
 0x236   : > { %v1604_v31 = vpop.f32.mrf.mxu3 }
 0x237   : > { %v1633_v32 = vpop.f32.mrf.mxu2  ;;  %v1605_v41 = vadd.f32 %v3514_v36, %v1604_v31 }
 0x238   : > { %v1577_v33 = vpop.f32.mrf.mxu0  ;;  %v4018_v44 = vadd.f32 %v3515_v39, %v1633_v32  ;;  %v1523_v32 = vld [vmem:[%s4417_s20 + $0x18] sm:$0xff] }
 0x239   : > { %v1578_v35 = vadd.f32 %v3513_v26, %v1577_v33 }
 0x23b   : > { %v3406_v37 = vpack.i.bf16 %v1578_v35, %v1576_v34  ;;  %v1658_v38 = vpack.c.bf16 %v1578_v35, %v1576_v34 }
 0x23d   : > { %3407 = vrot.lane.b32.xlu1 %v3406_v37, %s3701_s13 }
 0x23e   : > { %v1606_v40 = vpop.f32.mrf.mxu3 }
 0x23f   : > { %v1607_v42 = vadd.f32 %v3514_v36, %v1606_v40  ;;  %v1635_v43 = vpop.f32.mrf.mxu2 }
 0x240   : > { %v4020_v45 = vadd.f32 %v3515_v39, %v1635_v43 }
 0x241   : > { %v3401_v46 = vpack.i.bf16 %v1607_v42, %v1605_v41  ;;  %v1682_v47 = vpack.c.bf16 %v1607_v42, %v1605_v41  ;;  %v1525_v42 = vld [vmem:[%s4417_s20 + $0x28] sm:$0xff] }
 0x242   : > { %v1706_v48 = vpack.c.bf16 %v4020_v45, %v4018_v44 }
 0x243   : > { %3402 = vrot.lane.b32.xlu0 %v3401_v46, %s3701_s13  ;;  %3392 = vrot.lane.b32.xlu2 %v3401_v46, %s3702_s3  ;;  %v1724_v0 = vsel %vm1710_vm15, %v1682_v47, 0 }
 0x24b   : > { %3397 = vrot.lane.b32.xlu2 %v3401_v46, %s3703_s14 }
 0x253   : > { %3412 = vrot.lane.b32.xlu2 %v3406_v37, %s3703_s14 }
 0x25b   : > { %3417 = vrot.lane.b32.xlu2 %v3406_v37, %s3702_s3  ;;  %v1524_v37 = vld [vmem:[%s4417_s20 + $0x20] sm:$0xff] }
 0x29d   : > { %v3393_v49 = vpop.permute.xlu2 %3392 }
 0x29e   : > { %v3395_v50 = vunpack.i.h.bf16 %v3393_v49  ;;  %v3394_v51 = vunpack.i.l.bf16 %v3393_v49  ;;  %v3421_v49 = vpack.i.bf16 %v4020_v45, %v4018_v44 }
 0x2a0   : > { %v1685_v52 = vpack.c.bf16 %v3395_v50, %v3394_v51  ;;  %v1526_v51 = vld [vmem:[%s4417_s20 + $0x30] sm:$0xff] }
 0x2a2   : > { %v1733_v53 = vsel %vm1710_vm15, %v1685_v52, 0 }
 0x2a3   : > { %1739 = vmatpush.bf16.xpose.msrb.mxu3 %v1733_v53 }
 0x2a5   : > { %v3398_v54 = vpop.permute.xlu2 %3397 }
 0x2a6   : > { %v3400_v55 = vunpack.i.h.bf16 %v3398_v54  ;;  %v3399_v56 = vunpack.i.l.bf16 %v3398_v54 }
 0x2a8   : > { %v1684_v57 = vpack.c.bf16 %v3400_v55, %v3399_v56  ;;  %v1527_v56 = vld [vmem:[%s4417_s20 + $0x38] sm:$0xff] }
 0x2aa   : > { %v1730_v58 = vsel %vm1710_vm15, %v1684_v57, 0 }
 0x2ab   : > { %1740 = vmatpush.bf16.xpose.msrb.mxu3 %v1730_v58 }
 0x2ad   : > { %v3413_v5 = vpop.permute.xlu2 %3412 }
 0x2ae   : > { %v3415_v6 = vunpack.i.h.bf16 %v3413_v5  ;;  %v3414_v7 = vunpack.i.l.bf16 %v3413_v5 }
 0x2af   : > { %v3408_v1 = vpop.permute.xlu1 %3407 }
 0x2b0   : > { %v3410_v2 = vunpack.i.h.bf16 %v3408_v1  ;;  %v3409_v3 = vunpack.i.l.bf16 %v3408_v1  ;;  %v1660_v9 = vpack.c.bf16 %v3415_v6, %v3414_v7 }
 0x2b2   : > { %v1659_v4 = vpack.c.bf16 %v3410_v2, %v3409_v3 }
 0x2b5   : > { %v3403_v59 = vpop.permute.xlu0 %3402  ;;  %v3418_v11 = vpop.permute.xlu2 %3417 }
 0x2b6   : > { %v3405_v60 = vunpack.i.h.bf16 %v3403_v59  ;;  %v3404_v61 = vunpack.i.l.bf16 %v3403_v59  ;;  %v3420_v12 = vunpack.i.h.bf16 %v3418_v11  ;;  %v3419_v13 = vunpack.i.l.bf16 %v3418_v11 }
 0x2b8   : > { %v1683_v62 = vpack.c.bf16 %v3405_v60, %v3404_v61  ;;  %v1661_v14 = vpack.c.bf16 %v3420_v12, %v3419_v13 }
 0x2ba   : > { %v1727_v63 = vsel %vm1710_vm15, %v1683_v62, 0 }
 0x2bb   : > { %1741 = vmatpush.bf16.xpose.msrb.mxu3 %v1727_v63 }
 0x2c3   : > { %1742 = vmatpush.bf16.xpose.msrb.mxu3 %v1724_v0 }
 0x2ca   : > { %3206 = vmatmul.msk.bf16.vlgmr.msrb.gmra.mxu3 %vm1710_vm15, %v1658_v38 }
 0x2da   : > { %3207 = vmatmul.msk.bf16.gmra.mxu3 %vm1710_vm15, %v1659_v4 }
 0x2ea   : > { %3208 = vmatmul.msk.bf16.gmra.mxu3 %vm1710_vm15, %v1660_v9 }
 0x2fa   : > { %3209 = vmatmul.msk.bf16.gmra.mxu3 %vm1710_vm15, %v1661_v14 }
 0x34d   : > { %v1744_v15 = vpop.f32.mrf.mxu3 }
 0x34e   : > { %v1764_v17 = vmul.f32 0.35355338, %v1744_v15 }
 0x350   : > { %v1772_v19 = vadd.f32 %v1764_v17, %v1520_v16 }
 0x352   : > { %v1781_v20 = vsel %vm1780_vm0, %v1772_v19, -inf }
 0x353   : > { %1782 = vmax.xlane.f32.xlu2 %v1781_v20 }
 0x355   : > { %v1746_v22 = vpop.f32.mrf.mxu3 }
 0x356   : > { %v1765_v24 = vmul.f32 0.35355338, %v1746_v22 }
 0x358   : > { %v1773_v25 = vadd.f32 %v1765_v24, %v1521_v23 }
 0x35a   : > { %v1784_v27 = vsel %vm1780_vm0, %v1773_v25, -inf }
 0x35b   : > { %1785 = vmax.xlane.f32.xlu0 %v1784_v27 }
 0x35d   : > { %v1749_v28 = vpop.f32.mrf.mxu3 }
 0x35e   : > { %v1766_v29 = vmul.f32 0.35355338, %v1749_v28 }
 0x360   : > { %v1774_v30 = vadd.f32 %v1766_v29, %v1522_v21 }
 0x362   : > { %v1787_v26 = vsel %vm1780_vm0, %v1774_v30, -inf }
 0x363   : > { %1788 = vmax.xlane.f32.xlu1 %v1787_v26 }
 0x365   : > { %v1751_v31 = vpop.f32.mrf.mxu3 }
 0x366   : > { %v1767_v33 = vmul.f32 0.35355338, %v1751_v31 }
 0x368   : > { %v1775_v34 = vadd.f32 %v1767_v33, %v1523_v32 }
 0x36a   : > { %v1790_v35 = vsel %vm1780_vm0, %v1775_v34, -inf }
 0x36b   : > { %1791 = vmax.xlane.f32.xlu2 %v1790_v35 }
 0x36d   : > { %v1754_v36 = vpop.f32.mrf.mxu3 }
 0x36e   : > { %v1768_v38 = vmul.f32 0.35355338, %v1754_v36 }
 0x370   : > { %v1776_v39 = vadd.f32 %v1768_v38, %v1524_v37 }
 0x372   : > { %v1793_v40 = vsel %vm1780_vm0, %v1776_v39, -inf }
 0x373   : > { %1794 = vmax.xlane.f32.xlu0 %v1793_v40 }
 0x375   : > { %v1756_v41 = vpop.f32.mrf.mxu3 }
 0x376   : > { %v1769_v43 = vmul.f32 0.35355338, %v1756_v41 }
 0x378   : > { %v1777_v46 = vadd.f32 %v1769_v43, %v1525_v42 }
 0x37a   : > { %v1796_v47 = vsel %vm1780_vm0, %v1777_v46, -inf }
 0x37b   : > { %1797 = vmax.xlane.f32.xlu2 %v1796_v47 }
 0x37c   : > { %3422 = vrot.lane.b32.xlu1 %v3421_v49, %s3702_s3 }
 0x37d   : > { %v1759_v50 = vpop.f32.mrf.mxu3 }
 0x37e   : > { %v1770_v52 = vmul.f32 0.35355338, %v1759_v50 }
 0x380   : > { %v1778_v53 = vadd.f32 %v1770_v52, %v1526_v51 }
 0x382   : > { %v1799_v54 = vsel %vm1780_vm0, %v1778_v53, -inf }
 0x383   : > { %1800 = vmax.xlane.f32.xlu0 %v1799_v54 }
 0x384   : > { %3432 = vrot.lane.b32.xlu1 %v3421_v49, %s3701_s13 }
 0x385   : > { %v1761_v55 = vpop.f32.mrf.mxu3 }
 0x386   : > { %v1771_v57 = vmul.f32 0.35355338, %v1761_v55 }
 0x388   : > { %v1779_v58 = vadd.f32 %v1771_v57, %v1527_v56 }
 0x38a   : > { %v1802_v59 = vsel %vm1780_vm0, %v1779_v58, -inf }
 0x38b   : > { %1803 = vmax.xlane.f32.xlu2 %v1802_v59 }
 0x397   : > { %3427 = vrot.lane.b32.xlu0 %v3421_v49, %s3703_s14 }
 0x3c6   : > { %v1783_v60 = vpop.xlane.xlu2 %1782 }
 0x3c7   : > { %v1805_v61 = vsub.f32 %v1772_v19, %v1783_v60 }
 0x3c9   : > { %v1813_v62 = vmul.f32 1.442695, %v1805_v61 }
 0x3cb   : > { %3537 = vpow2.f32 %v1813_v62 }
 0x3ce   : > { %v1786_v63 = vpop.xlane.xlu0 %1785 }
 0x3cf   : > { %v1806_v0 = vsub.f32 %v1773_v25, %v1786_v63 }
 0x3d1   : > { %v4058_v1 = vpop.eup %3537  ;;  %v1815_v2 = vmul.f32 1.442695, %v1806_v0 }
 0x3d2   : > { %v1829_v3 = vsel %vm1780_vm0, %v4058_v1, 0.0 }
 0x3d3   : > { %3539 = vpow2.f32 %v1815_v2  ;;  %1830 = vadd.xlane.f32.xlu2 %v1829_v3 }
 0x3d6   : > { %v1789_v4 = vpop.xlane.xlu1 %1788 }
 0x3d7   : > { %v1807_v5 = vsub.f32 %v1774_v30, %v1789_v4 }
 0x3d9   : > { %v4062_v6 = vpop.eup %3539  ;;  %v1817_v7 = vmul.f32 1.442695, %v1807_v5 }
 0x3da   : > { %v1832_v9 = vsel %vm1780_vm0, %v4062_v6, 0.0 }
 0x3db   : > { %3541 = vpow2.f32 %v1817_v7  ;;  %1833 = vadd.xlane.f32.xlu2 %v1832_v9 }
 0x3de   : > { %v1792_v11 = vpop.xlane.xlu2 %1791 }
 0x3df   : > { %v1808_v12 = vsub.f32 %v1775_v34, %v1792_v11 }
 0x3e1   : > { %v4066_v13 = vpop.eup %3541  ;;  %v1819_v14 = vmul.f32 1.442695, %v1808_v12 }
 0x3e2   : > { %v1835_v15 = vsel %vm1780_vm0, %v4066_v13, 0.0 }
 0x3e3   : > { %3543 = vpow2.f32 %v1819_v14  ;;  %1836 = vadd.xlane.f32.xlu2 %v1835_v15 }
 0x3e6   : > { %v1795_v16 = vpop.xlane.xlu0 %1794 }
 0x3e7   : > { %v1809_v17 = vsub.f32 %v1776_v39, %v1795_v16 }
 0x3e9   : > { %v3544_v19 = vpop.eup %3543  ;;  %v1821_v20 = vmul.f32 1.442695, %v1809_v17 }
 0x3ea   : > { %v1838_v22 = vsel %vm1780_vm0, %v3544_v19, 0.0 }
 0x3eb   : > { %3545 = vpow2.f32 %v1821_v20  ;;  %1839 = vadd.xlane.f32.xlu0 %v1838_v22 }
 0x3ee   : > { %v3423_v23 = vpop.permute.xlu1 %3422  ;;  %v1798_v24 = vpop.xlane.xlu2 %1797 }
 0x3ef   : > { %v3425_v25 = vunpack.i.h.bf16 %v3423_v23  ;;  %v3424_v27 = vunpack.i.l.bf16 %v3423_v23  ;;  %v1810_v28 = vsub.f32 %v1777_v46, %v1798_v24 }
 0x3f1   : > { %v3546_v21 = vpop.eup %3545  ;;  %v1823_v29 = vmul.f32 1.442695, %v1810_v28  ;;  %v1709_v30 = vpack.c.bf16 %v3425_v25, %v3424_v27 }
 0x3f2   : > { %v1841_v26 = vsel %vm1780_vm0, %v3546_v21, 0.0 }
 0x3f3   : > { %3547 = vpow2.f32 %v1823_v29  ;;  %1889 = vmatpush.bf16.msrb.mxu0 %v1709_v30  ;;  %1842 = vadd.xlane.f32.xlu1 %v1841_v26  ;;  %v3319_v30 = vld [vmem:[%s4418_s27 + $0x8] sm:$0xff]  ;;  %v3318_v26 = vld [vmem:[%s4418_s27] sm:$0xff]  ;;  %s4427_s27 = sld [smem:[#allocation10_spill]] }
 0x3f4   : > { %1971 = vmatpush.bf16.msra.mxu1 %v3319_v30 }
 0x3f6   : > { %v1801_v31 = vpop.xlane.xlu0 %1800  ;;  %v3433_v42 = vpop.permute.xlu1 %3432 }
 0x3f7   : > { %v1811_v32 = vsub.f32 %v1778_v53, %v1801_v31  ;;  %v3435_v50 = vunpack.i.h.bf16 %v3433_v42  ;;  %v3434_v51 = vunpack.i.l.bf16 %v3433_v42 }
 0x3f8   : > { %1972 = vmatpush.bf16.msra.mxu1 %v3318_v26 }
 0x3f9   : > { %v3548_v33 = vpop.eup %3547  ;;  %v1825_v34 = vmul.f32 1.442695, %v1811_v32  ;;  %v1707_v53 = vpack.c.bf16 %v3435_v50, %v3434_v51  ;;  %v3324_v50 = vld [vmem:[%s3933_s19 + $0x8] sm:$0xff]  ;;  %v3323_v51 = vld [vmem:[%s3933_s19] sm:$0xff]  ;;  %s4423_s19 = sld [smem:[#allocation21_spill]] }
 0x3fa   : > { %v1844_v35 = vsel %vm1780_vm0, %v3548_v33, 0.0 }
 0x3fb   : > { %3549 = vpow2.f32 %v1825_v34  ;;  %1845 = vadd.xlane.f32.xlu2 %v1844_v35 }
 0x3fc   : > { %2161 = vmatpush.bf16.msrb.mxu1 %v3324_v50 }
 0x3fe   : > { %v1804_v36 = vpop.xlane.xlu2 %1803 }
 0x3ff   : > { %v1812_v37 = vsub.f32 %v1779_v58, %v1804_v36 }
 0x400   : > { %2162 = vmatpush.bf16.msrb.mxu1 %v3323_v51 }
 0x401   : > { %v3550_v38 = vpop.eup %3549  ;;  %v1827_v39 = vmul.f32 1.442695, %v1812_v37 }
 0x402   : > { %v1847_v40 = vsel %vm1780_vm0, %v3550_v38, 0.0 }
 0x403   : > { %3551 = vpow2.f32 %v1827_v39  ;;  %1848 = vadd.xlane.f32.xlu2 %v1847_v40 }
 0x409   : > { %v3552_v41 = vpop.eup %3551  ;;  %v3428_v43 = vpop.permute.xlu0 %3427 }
 0x40a   : > { %v3430_v46 = vunpack.i.h.bf16 %v3428_v43  ;;  %v3429_v47 = vunpack.i.l.bf16 %v3428_v43  ;;  %v1850_v49 = vsel %vm1780_vm0, %v3552_v41, 0.0 }
 0x40b   : > { %1851 = vadd.xlane.f32.xlu2 %v1850_v49 }
 0x40c   : > { %v1708_v52 = vpack.c.bf16 %v3430_v46, %v3429_v47 }
 0x40e   : > { %1890 = vmatpush.bf16.msrb.mxu0 %v1708_v52  ;;  %v4100_v52 = vld [vmem:[%s4419_s18] sm:$0xff] }
 0x412   : > { %1891 = vmatpush.bf16.msrb.mxu0 %v1707_v53  ;;  %v3516_v53 = vld [vmem:[%s4422_s26] ss:$0 sm:$0xff] }
 0x416   : > { %1892 = vmatpush.bf16.msrb.mxu0 %v1706_v48 }
 0x446   : > { %v1831_v54 = vpop.xlane.xlu2 %1830 }
 0x447   : > { %3553 = vrcp.f32 %v1831_v54 }
 0x44d   : > { %v3554_v56 = vpop.eup %3553 }
 0x44e   : > { %v1834_v55 = vpop.xlane.xlu2 %1833  ;;  %v1861_v58 = vmul.f32 %v3554_v56, %v4058_v1 }
 0x44f   : > { %3555 = vrcp.f32 %v1834_v55 }
 0x455   : > { %v3556_v57 = vpop.eup %3555 }
 0x456   : > { %v1862_v59 = vmul.f32 %v3556_v57, %v4062_v6  ;;  %v1837_v61 = vpop.xlane.xlu2 %1836 }
 0x457   : > { %3557 = vrcp.f32 %v1837_v61 }
 0x458   : > { %v1869_v60 = vpack.c.bf16 %v1862_v59, %v1861_v58 }
 0x45a   : > { %3210 = vmatmul.msk.bf16.vlgmr.msrb.gmra.mxu0 %vm1780_vm0, %v1869_v60 }
 0x45d   : > { %v3558_v63 = vpop.eup %3557 }
 0x45e   : > { %v1840_v62 = vpop.xlane.xlu0 %1839  ;;  %v1863_v45 = vmul.f32 %v3558_v63, %v4066_v13  ;;  %v3517_v63 = vld [vmem:[%s1366_s24] ss:$0 sm:$0xff]  ;;  %s4424_s24 = sld [smem:[#allocation22_spill]] }
 0x45f   : > { %3559 = vrcp.f32 %v1840_v62 }
 0x464   : > { %s4426_s1 = scalar_lea.vmem %s4424_s24, %s3896_s0 }
 0x465   : > { %v3560_v44 = vpop.eup %3559 }
 0x466   : > { %v1864_v48 = vmul.f32 %v3560_v44, %v3544_v19  ;;  %v1843_v2 = vpop.xlane.xlu1 %1842 }
 0x467   : > { %3561 = vrcp.f32 %v1843_v2 }
 0x468   : > { %v1870_v0 = vpack.c.bf16 %v1864_v48, %v1863_v45 }
 0x46a   : > { %3211 = vmatmul.msk.bf16.gmra.mxu0 %vm1780_vm0, %v1870_v0 }
 0x46d   : > { %v3562_v3 = vpop.eup %3561 }
 0x46e   : > { %v1846_v1 = vpop.xlane.xlu2 %1845  ;;  %v1865_v6 = vmul.f32 %v3562_v3, %v3546_v21 }
 0x46f   : > { %3563 = vrcp.f32 %v1846_v1 }
 0x475   : > { %v3564_v4 = vpop.eup %3563 }
 0x476   : > { %v1849_v5 = vpop.xlane.xlu2 %1848  ;;  %v1866_v7 = vmul.f32 %v3564_v4, %v3548_v33 }
 0x477   : > { %3565 = vrcp.f32 %v1849_v5 }
 0x478   : > { %v1871_v9 = vpack.c.bf16 %v1866_v7, %v1865_v6 }
 0x47a   : > { %3212 = vmatmul.msk.bf16.gmra.mxu0 %vm1780_vm0, %v1871_v9 }
 0x47d   : > { %v3566_v12 = vpop.eup %3565 }
 0x47e   : > { %v1852_v11 = vpop.xlane.xlu2 %1851  ;;  %v1867_v14 = vmul.f32 %v3566_v12, %v3550_v38 }
 0x47f   : > { %3567 = vrcp.f32 %v1852_v11 }
 0x485   : > { %v3568_v13 = vpop.eup %3567 }
 0x486   : > { %v1868_v15 = vmul.f32 %v3568_v13, %v3552_v41 }
 0x488   : > { %v1872_v16 = vpack.c.bf16 %v1868_v15, %v1867_v14  ;;  %v3322_v14 = vld [vmem:[%s3928_s2 + $0x8] sm:$0xff] }
 0x489   : > { %2124 = vmatpush.bf16.msrb.mxu2 %v3322_v14 }
 0x48a   : > { %3213 = vmatmul.msk.bf16.gmra.mxu0 %vm1780_vm0, %v1872_v16 }
 0x4d7   : > { %v1894_v17 = vpop.f32.mrf.mxu0 }
 0x4df   : > { %v1896_v19 = vpop.f32.mrf.mxu0 }
 0x4e7   : > { %v1899_v20 = vpop.f32.mrf.mxu0 }
 0x4ef   : > { %v1901_v22 = vpop.f32.mrf.mxu0 }
 0x4f0   : > { %v3436_v23 = vpack.i.bf16 %v1901_v22, %v1899_v20 }
 0x4f2   : > { %3437 = vrot.lane.b32.xlu2 %v3436_v23, %s3704_s7 }
 0x4f7   : > { %v1904_v24 = vpop.f32.mrf.mxu0 }
 0x4ff   : > { %v1906_v25 = vpop.f32.mrf.mxu0 }
 0x500   : > { %v3441_v27 = vpack.i.bf16 %v1906_v25, %v1904_v24 }
 0x502   : > { %3442 = vrot.lane.b32.xlu0 %v3441_v27, %s3705_s10 }
 0x507   : > { %v1909_v28 = vpop.f32.mrf.mxu0 }
 0x50f   : > { %v1911_v21 = vpop.f32.mrf.mxu0 }
 0x510   : > { %v3446_v29 = vpack.i.bf16 %v1911_v21, %v1909_v28 }
 0x512   : > { %3447 = vrot.lane.b32.xlu1 %v3446_v29, %s3706_s15 }
 0x54c   : > { %v3438_v31 = vpop.permute.xlu2 %3437 }
 0x54d   : > { %v3440_v33 = vunpack.i.h.bf16 %v3438_v31  ;;  %v3439_v34 = vunpack.i.l.bf16 %v3438_v31 }
 0x54f   : > { %v1939_v38 = vsel %vm1710_vm15, %v1896_v19, %v3440_v33  ;;  %v1938_v39 = vsel %vm1710_vm15, %v1894_v17, %v3439_v34  ;;  %v3321_v17 = vld [vmem:[%s3928_s2] sm:$0xff]  ;;  %s4425_s2 = scalar_lea.vmem %s4423_s19, %s3896_s0 }
 0x550   : > { %2125 = vmatpush.bf16.msrb.mxu2 %v3321_v17 }
 0x574   : > { %v3443_v32 = vpop.permute.xlu0 %3442 }
 0x575   : > { %v3445_v35 = vunpack.i.h.bf16 %v3443_v32  ;;  %v3444_v36 = vunpack.i.l.bf16 %v3443_v32 }
 0x577   : > { %v1941_v42 = vsel %vm1940_vm2, %v1938_v39, %v3444_v36  ;;  %v1942_v43 = vsel %vm1940_vm2, %v1939_v38, %v3445_v35 }
 0x584   : > { %v3448_v37 = vpop.permute.xlu1 %3447 }
 0x585   : > { %v3450_v40 = vunpack.i.h.bf16 %v3448_v37  ;;  %v3449_v41 = vunpack.i.l.bf16 %v3448_v37 }
 0x587   : > { %v1944_v46 = vsel %vm1943_vm3, %v1941_v42, %v3449_v41  ;;  %v1945_v47 = vsel %vm1943_vm3, %v1942_v43, %v3450_v40 }
 0x588   : > { %v1946_v49 = vpack.c.bf16 %v1945_v47, %v1944_v46 }
 0x58a   : > { %3222 = vmatmul.msk.bf16.vlgmr.msra.gmra.mxu1 %vm1425_vm1, %v1946_v49 }
 0x59a   : > { %3244 = vmatmul.msk.bf16.vlgmr.msrb.gmra.mxu1 %vm1425_vm1, %v4100_v52 }
 0x607   : > { %v1974_v54 = vpop.f32.mrf.mxu1 }
 0x608   : > { %v1975_v55 = vadd.f32 %v3516_v53, %v1974_v54 }
 0x60a   : > { %v4108_v56 = vadd.f32 %v1975_v55, %v3967_v8 }
 0x60c   : > { %v1983_v57 = vsel %vm1425_vm1, %v4108_v56, 0.0 }
 0x60d   : > { %1984 = vadd.xlane.f32.xlu2 %v1983_v57 }
 0x60f   : > { %v1976_v58 = vpop.f32.mrf.mxu1 }
 0x610   : > { %v1977_v59 = vadd.f32 %v3516_v53, %v1976_v58 }
 0x612   : > { %v4113_v60 = vadd.f32 %v1977_v59, %v3971_v10 }
 0x614   : > { %v1986_v61 = vsel %vm1425_vm1, %v4113_v60, 0.0 }
 0x615   : > { %1987 = vadd.xlane.f32.xlu0 %v1986_v61 }
 0x617   : > { %v2164_v62 = vpop.f32.mrf.mxu1 }
 0x618   : > { %v4121_v45 = vadd.f32 %v3517_v63, %v2164_v62 }
 0x61f   : > { %v2166_v0 = vpop.f32.mrf.mxu1 }
 0x620   : > { %v4126_v2 = vadd.f32 %v3517_v63, %v2166_v0 }
 0x622   : > { %v3451_v1 = vpack.i.bf16 %v4126_v2, %v4121_v45  ;;  %v2242_v59 = vpack.c.bf16 %v4126_v2, %v4121_v45 }
 0x629   : > { %3452 = vrot.lane.b32.xlu0 %v3451_v1, %s3702_s3 }
 0x680   : > { %v1985_v44 = vpop.xlane.xlu2 %1984 }
 0x681   : > { %v1989_v8 = vmul.f32 %v1985_v44, %v3975_v18 }
 0x683   : > { %v4124_v48 = vsub.f32 %v4108_v56, %v1989_v8  ;;  %v2283_v8 = vsel %vm1710_vm15, %v2242_v59, 0 }
 0x685   : > { %v1993_v10 = vmul.f32 %v4124_v48, %v4124_v48 }
 0x687   : > { %v1995_v3 = vsel %vm1425_vm1, %v1993_v10, 0.0 }
 0x688   : > { %v1988_v4 = vpop.xlane.xlu0 %1987  ;;  %1996 = vadd.xlane.f32.xlu1 %v1995_v3 }
 0x689   : > { %v1990_v5 = vmul.f32 %v1988_v4, %v3975_v18 }
 0x68b   : > { %v4136_v6 = vsub.f32 %v4113_v60, %v1990_v5 }
 0x68d   : > { %v1994_v7 = vmul.f32 %v4136_v6, %v4136_v6 }
 0x68f   : > { %v1998_v9 = vsel %vm1425_vm1, %v1994_v7, 0.0 }
 0x690   : > { %1999 = vadd.xlane.f32.xlu2 %v1998_v9 }
 0x69b   : > { %v3453_v13 = vpop.permute.xlu0 %3452 }
 0x69c   : > { %v3455_v15 = vunpack.i.h.bf16 %v3453_v13  ;;  %v3454_v16 = vunpack.i.l.bf16 %v3453_v13 }
 0x69e   : > { %v2245_v19 = vpack.c.bf16 %v3455_v15, %v3454_v16  ;;  %v3518_v16 = vld [vmem:[%s4425_s2] ss:$0 sm:$0xff] }
 0x6a0   : > { %v2292_v22 = vsel %vm1710_vm15, %v2245_v19, 0 }
 0x6a1   : > { %3462 = vrot.lane.b32.xlu1 %v3451_v1, %s3701_s13  ;;  %2298 = vmatpush.bf16.xpose.msra.mxu1 %v2292_v22 }
 0x6a8   : > { %3457 = vrot.lane.b32.xlu2 %v3451_v1, %s3703_s14 }
 0x6fb   : > { %v1997_v11 = vpop.xlane.xlu1 %1996 }
 0x6fc   : > { %v2001_v12 = vmul.f32 0.032258064, %v1997_v11 }
 0x6fe   : > { %3569 = vrsqrt.f32 %v2001_v12  ;;  %vm2010_vm4 = vcmp.eq.f32.partialorder %v2001_v12, inf  ;;  %v2013_v37 = vand.u32 2147483648, %v2001_v12  ;;  %vm2012_vm5 = vcmp.eq.f32.partialorder %v2001_v12, 0.0 }
 0x703   : > { %v2000_v20 = vpop.xlane.xlu2 %1999 }
 0x704   : > { %v3570_v23 = vpop.eup %3569  ;;  %v2002_v24 = vmul.f32 0.032258064, %v2000_v20 }
 0x705   : > { %v2004_v25 = vmul.f32 %v3570_v23, %v2001_v12 }
 0x706   : > { %3571 = vrsqrt.f32 %v2002_v24  ;;  %vm2022_vm6 = vcmp.eq.f32.partialorder %v2002_v24, inf  ;;  %v2025_v54 = vand.u32 2147483648, %v2002_v24  ;;  %vm2024_vm7 = vcmp.eq.f32.partialorder %v2002_v24, 0.0 }
 0x707   : > { %v2005_v27 = vmul.f32 %v3570_v23, %v2004_v25 }
 0x709   : > { %v2006_v28 = vmul.f32 0.5, %v2005_v27 }
 0x70b   : > { %v2007_v21 = vsub.f32 1.5, %v2006_v28  ;;  %v3458_v29 = vpop.permute.xlu2 %3457 }
 0x70c   : > { %v3572_v30 = vpop.eup %3571  ;;  %v3460_v26 = vunpack.i.h.bf16 %v3458_v29  ;;  %v3459_v31 = vunpack.i.l.bf16 %v3458_v29  ;;  %v3325_v29 = vld [vmem:[%s3938_s25] sm:$0xff] }
 0x70d   : > { %v2008_v32 = vmul.f32 %v3570_v23, %v2007_v21  ;;  %v2016_v33 = vmul.f32 %v3572_v30, %v2002_v24 }
 0x70e   : > { %v2244_v34 = vpack.c.bf16 %v3460_v26, %v3459_v31  ;;  %v3520_v26 = vld [vmem:[%s1358_s17] ss:$0 sm:$0xff] }
 0x70f   : > { %v2009_v35 = vmul.f32 %v2008_v32, %v2001_v12  ;;  %v2017_v36 = vmul.f32 %v3572_v30, %v2016_v33 }
 0x710   : > { %v2289_v38 = vsel %vm1710_vm15, %v2244_v34, 0 }
 0x711   : > { %v2011_v39 = vsel %vm2010_vm4, %v2001_v12, %v2009_v35  ;;  %v2018_v40 = vmul.f32 0.5, %v2017_v36  ;;  %2299 = vmatpush.bf16.xpose.msra.mxu1 %v2289_v38 }
 0x712   : > { %v2014_v41 = vsel %vm2012_vm5, %v2013_v37, %v2011_v39 }
 0x713   : > { %v2027_v42 = vadd.f32 1e-06, %v2014_v41  ;;  %v2019_v43 = vsub.f32 1.5, %v2018_v40  ;;  %v3463_v46 = vpop.permute.xlu1 %3462  ;;  %v2072_v40 = vld [vmem:[%s4427_s27] sm:$0xff] }
 0x714   : > { %v3465_v47 = vunpack.i.h.bf16 %v3463_v46  ;;  %v3464_v49 = vunpack.i.l.bf16 %v3463_v46 }
 0x715   : > { %3573 = vrcp.f32 %v2027_v42  ;;  %v2020_v50 = vmul.f32 %v3572_v30, %v2019_v43  ;;  %v2040_v10 = vand.u32 2147483648, %v2027_v42  ;;  %vm2034_vm9 = vweird.f32 %v2027_v42 }
 0x716   : > { %v2243_v51 = vpack.c.bf16 %v3465_v47, %v3464_v49  ;;  %v2038_v3 = vand.u32 2147483647, %v2027_v42 }
 0x717   : > { %v2021_v53 = vmul.f32 %v2020_v50, %v2002_v24  ;;  %v2041_v2 = vor.u32 1.1754944e-38, %v2040_v10 }
 0x718   : > { %v2286_v55 = vsel %vm1710_vm15, %v2243_v51, 0  ;;  %vm2039_vm11 = vcmp.eq.f32.partialorder %v2038_v3, 8.507059e+37  ;;  %v2073_v51 = vld [vmem:[%s4427_s27 + $0x8] sm:$0xff] }
 0x719   : > { %v2023_v57 = vsel %vm2022_vm6, %v2002_v24, %v2021_v53  ;;  %2300 = vmatpush.bf16.xpose.msra.mxu1 %v2286_v55  ;;  %v3519_v24 = vld [vmem:[%s4426_s1] ss:$0 sm:$0xff] }
 0x71a   : > { %v2026_v58 = vsel %vm2024_vm7, %v2025_v54, %v2023_v57 }
 0x71b   : > { %v3574_v61 = vpop.eup %3573  ;;  %v2028_v62 = vadd.f32 1e-06, %v2026_v58 }
 0x71c   : > { %v2030_v63 = vmul.f32 %v3574_v61, %v2027_v42  ;;  %vm2035_vm8 = vweird.f32 %v3574_v61 }
 0x71d   : > { %3575 = vrcp.f32 %v2028_v62  ;;  %vm2036_vm10 = vmor %vm2034_vm9, %vm2035_vm8  ;;  %v2054_v11 = vand.u32 2147483648, %v2028_v62  ;;  %v2052_v13 = vand.u32 2147483647, %v2028_v62  ;;  %vm2048_vm13 = vweird.f32 %v2028_v62 }
 0x71e   : > { %v2031_v44 = vsub.f32 1.0, %v2030_v63  ;;  %v3521_v63 = vld [vmem:[%s1374_s29] ss:$0 sm:$0xff] }
 0x71f   : > { %v2055_v17 = vor.u32 1.1754944e-38, %v2054_v11  ;;  %vm2053_vm4 = vcmp.eq.f32.partialorder %v2052_v13, 8.507059e+37 }
 0x720   : > { %v2032_v0 = vmul.f32 %v3574_v61, %v2031_v44 }
 0x721   : > { %2301 = vmatpush.bf16.xpose.msra.mxu1 %v2283_v8 }
 0x722   : > { %v2033_v1 = vadd.f32 %v3574_v61, %v2032_v0 }
 0x723   : > { %v3576_v4 = vpop.eup %3575 }
 0x724   : > { %v2037_v5 = vsel %vm2036_vm10, %v3574_v61, %v2033_v1  ;;  %v2044_v45 = vmul.f32 %v3576_v4, %v2028_v62  ;;  %vm2049_vm12 = vweird.f32 %v3576_v4 }
 0x725   : > { %v2042_v9 = vsel %vm2039_vm11, %v2041_v2, %v2037_v5  ;;  %vm2050_vm14 = vmor %vm2048_vm13, %vm2049_vm12 }
 0x726   : > { %v2045_v7 = vsub.f32 1.0, %v2044_v45  ;;  %v2057_v15 = vmul.f32 %v2042_v9, %v4124_v48  ;;  %v3326_v48 = vld [vmem:[%s3938_s25 + $0x8] sm:$0xff]  ;;  %v2075_v9 = vld [vmem:[%s4427_s27 + $0x18] sm:$0xff] }
 0x727   : > { %2190 = vmatpush.bf16.msra.mxu2 %v3326_v48  ;;  %v2077_v48 = vld [vmem:[%s4427_s27 + $0x28] sm:$0xff] }
 0x728   : > { %v2046_v12 = vmul.f32 %v3576_v4, %v2045_v7  ;;  %v2062_v23 = vmul.f32 %v3518_v16, %v2057_v15 }
 0x72a   : > { %v2047_v14 = vadd.f32 %v3576_v4, %v2046_v12  ;;  %v2067_v27 = vadd.f32 %v3519_v24, %v2062_v23 }
 0x72b   : > { %2191 = vmatpush.bf16.msra.mxu2 %v3325_v29 }
 0x72c   : > { %v2051_v19 = vsel %vm2050_vm14, %v3576_v4, %v2047_v14  ;;  %v2074_v4 = vld [vmem:[%s4427_s27 + $0x10] sm:$0xff] }
 0x72d   : > { %v2056_v20 = vsel %vm2053_vm4, %v2055_v17, %v2051_v19 }
 0x72e   : > { %v2058_v22 = vmul.f32 %v2056_v20, %v4136_v6 }
 0x730   : > { %v2063_v25 = vmul.f32 %v3518_v16, %v2058_v22  ;;  %v2076_v16 = vld [vmem:[%s4427_s27 + $0x20] sm:$0xff] }
 0x732   : > { %v2068_v28 = vadd.f32 %v3519_v24, %v2063_v25 }
 0x734   : > { %v2069_v21 = vpack.c.bf16 %v2068_v28, %v2067_v27 }
 0x736   : > { %3231 = vmatmul.msk.bf16.vlgmr.msrb.gmra.mxu2 %vm1425_vm1, %v2069_v21 }
 0x746   : > { %3253 = vmatmul.msk.bf16.vlgmr.msra.gmra.mxu2 %vm1425_vm1, %v4100_v52 }
 0x7b9   : > { %v2127_v30 = vpop.f32.mrf.mxu2 }
 0x7ba   : > { %v2128_v31 = vadd.f32 %v3520_v26, %v2127_v30 }
 0x7c1   : > { %v2129_v6 = vpop.f32.mrf.mxu2 }
 0x7c2   : > { %v2130_v32 = vadd.f32 %v3520_v26, %v2129_v6 }
 0x7c4   : > { %v2218_v33 = vpack.c.bf16 %v2130_v32, %v2128_v31  ;;  %v3471_v34 = vpack.i.bf16 %v2130_v32, %v2128_v31  ;;  %v2078_v32 = vld [vmem:[%s4427_s27 + $0x30] sm:$0xff] }
 0x7c6   : > { %3472 = vrot.lane.b32.xlu2 %v3471_v34, %s3703_s14  ;;  %3467 = vrot.lane.b32.xlu0 %v3471_v34, %s3701_s13 }
 0x7c7   : > { %3254 = vmatmul.msk.bf16.vlgmr.msra.gmra.mxu1 %vm1710_vm15, %v2218_v33 }
 0x7c9   : > { %v2193_v58 = vpop.f32.mrf.mxu2 }
 0x7ca   : > { %v4181_v8 = vadd.f32 %v3521_v63, %v2193_v58 }
 0x7ce   : > { %3477 = vrot.lane.b32.xlu0 %v3471_v34, %s3702_s3 }
 0x7d1   : > { %v2195_v44 = vpop.f32.mrf.mxu2 }
 0x7d2   : > { %v4183_v0 = vadd.f32 %v3521_v63, %v2195_v44 }
 0x7d4   : > { %v3481_v10 = vpack.i.bf16 %v4183_v0, %v4181_v8  ;;  %v2266_v1 = vpack.c.bf16 %v4183_v0, %v4181_v8 }
 0x820   : > { %v3473_v38 = vpop.permute.xlu2 %3472 }
 0x821   : > { %v3475_v42 = vunpack.i.h.bf16 %v3473_v38  ;;  %v3474_v43 = vunpack.i.l.bf16 %v3473_v38 }
 0x823   : > { %v2220_v49 = vpack.c.bf16 %v3475_v42, %v3474_v43 }
 0x838   : > { %v3468_v35 = vpop.permute.xlu0 %3467 }
 0x839   : > { %v3470_v52 = vunpack.i.h.bf16 %v3468_v35  ;;  %v3469_v36 = vunpack.i.l.bf16 %v3468_v35 }
 0x83b   : > { %v2219_v37 = vpack.c.bf16 %v3470_v52, %v3469_v36 }
 0x83d   : > { %3255 = vmatmul.msk.bf16.gmra.mxu1 %vm1710_vm15, %v2219_v37 }
 0x840   : > { %v3478_v57 = vpop.permute.xlu0 %3477 }
 0x841   : > { %v3480_v59 = vunpack.i.h.bf16 %v3478_v57  ;;  %v3479_v61 = vunpack.i.l.bf16 %v3478_v57 }
 0x843   : > { %v2221_v62 = vpack.c.bf16 %v3480_v59, %v3479_v61 }
 0x844   : > { %v2303_v39 = vpop.f32.mrf.mxu1 }
 0x845   : > { %v2323_v41 = vmul.f32 0.35355338, %v2303_v39  ;;  %v2079_v39 = vld [vmem:[%s4427_s27 + $0x38] sm:$0xff] }
 0x847   : > { %v2331_v46 = vadd.f32 %v2323_v41, %v2072_v40 }
 0x849   : > { %v2339_v47 = vsel %vm1780_vm0, %v2331_v46, -inf }
 0x84a   : > { %2340 = vmax.xlane.f32.xlu1 %v2339_v47 }
 0x84c   : > { %v2305_v50 = vpop.f32.mrf.mxu1 }
 0x84d   : > { %v2324_v53 = vmul.f32 0.35355338, %v2305_v50  ;;  %3256 = vmatmul.msk.bf16.gmra.mxu1 %vm1710_vm15, %v2220_v49 }
 0x84f   : > { %v2332_v54 = vadd.f32 %v2324_v53, %v2073_v51 }
 0x851   : > { %v2342_v55 = vsel %vm1780_vm0, %v2332_v54, -inf }
 0x852   : > { %2343 = vmax.xlane.f32.xlu2 %v2342_v55 }
 0x85d   : > { %3257 = vmatmul.msk.bf16.gmra.mxu1 %vm1710_vm15, %v2221_v62 }
 0x86a   : > { %3482 = vrot.lane.b32.xlu2 %v3481_v10, %s3702_s3 }
 0x8ba   : > { %v2308_v3 = vpop.f32.mrf.mxu1 }
 0x8bb   : > { %v2325_v5 = vmul.f32 0.35355338, %v2308_v3 }
 0x8bd   : > { %v2333_v45 = vadd.f32 %v2325_v5, %v2074_v4  ;;  %v2341_v17 = vpop.xlane.xlu1 %2340 }
 0x8be   : > { %v2363_v22 = vsub.f32 %v2331_v46, %v2341_v17 }
 0x8bf   : > { %v2345_v2 = vsel %vm1780_vm0, %v2333_v45, -inf }
 0x8c0   : > { %2346 = vmax.xlane.f32.xlu0 %v2345_v2  ;;  %v2371_v28 = vmul.f32 1.442695, %v2363_v22 }
 0x8c2   : > { %v2310_v7 = vpop.f32.mrf.mxu1  ;;  %3577 = vpow2.f32 %v2371_v28 }
 0x8c3   : > { %v2326_v11 = vmul.f32 0.35355338, %v2310_v7 }
 0x8c5   : > { %v2334_v12 = vadd.f32 %v2326_v11, %v2075_v9  ;;  %v2344_v14 = vpop.xlane.xlu2 %2343 }
 0x8c6   : > { %v2364_v52 = vsub.f32 %v2332_v54, %v2344_v14 }
 0x8c7   : > { %v2348_v13 = vsel %vm1780_vm0, %v2334_v12, -inf }
 0x8c8   : > { %2349 = vmax.xlane.f32.xlu2 %v2348_v13  ;;  %v4199_v34 = vpop.eup %3577  ;;  %v2373_v38 = vmul.f32 1.442695, %v2364_v52 }
 0x8c9   : > { %v2387_v36 = vsel %vm1780_vm0, %v4199_v34, 0.0 }
 0x8ca   : > { %v2313_v15 = vpop.f32.mrf.mxu1  ;;  %3579 = vpow2.f32 %v2373_v38 }
 0x8cb   : > { %v2327_v19 = vmul.f32 0.35355338, %v2313_v15 }
 0x8cd   : > { %v2335_v20 = vadd.f32 %v2327_v19, %v2076_v16  ;;  %v3483_v24 = vpop.permute.xlu2 %3482 }
 0x8ce   : > { %v3485_v25 = vunpack.i.h.bf16 %v3483_v24  ;;  %v3484_v27 = vunpack.i.l.bf16 %v3483_v24 }
 0x8cf   : > { %v2351_v23 = vsel %vm1780_vm0, %v2335_v20, -inf }
 0x8d0   : > { %2352 = vmax.xlane.f32.xlu1 %v2351_v23  ;;  %v2269_v30 = vpack.c.bf16 %v3485_v25, %v3484_v27  ;;  %v3580_v46 = vpop.eup %3579 }
 0x8d1   : > { %v2390_v47 = vsel %vm1780_vm0, %v3580_v46, 0.0 }
 0x8d2   : > { %v2315_v21 = vpop.f32.mrf.mxu1  ;;  %2447 = vmatpush.bf16.msrb.mxu2 %v2269_v30 }
 0x8d3   : > { %v2328_v29 = vmul.f32 0.35355338, %v2315_v21 }
 0x8d5   : > { %v2336_v26 = vadd.f32 %v2328_v29, %v2077_v48 }
 0x8d7   : > { %v2354_v6 = vsel %vm1780_vm0, %v2336_v26, -inf }
 0x8d8   : > { %2355 = vmax.xlane.f32.xlu0 %v2354_v6 }
 0x8da   : > { %v2318_v31 = vpop.f32.mrf.mxu1 }
 0x8db   : > { %v2329_v33 = vmul.f32 0.35355338, %v2318_v31 }
 0x8dd   : > { %v2337_v35 = vadd.f32 %v2329_v33, %v2078_v32 }
 0x8df   : > { %v2357_v37 = vsel %vm1780_vm0, %v2337_v35, -inf }
 0x8e0   : > { %3492 = vrot.lane.b32.xlu2 %v3481_v10, %s3701_s13  ;;  %2388 = vadd.xlane.f32.xlu0 %v2387_v36 }
 0x8e1   : > { %2358 = vmax.xlane.f32.xlu1 %v2357_v37 }
 0x8e2   : > { %v2320_v40 = vpop.f32.mrf.mxu1 }
 0x8e3   : > { %v2330_v41 = vmul.f32 0.35355338, %v2320_v40 }
 0x8e5   : > { %v2338_v42 = vadd.f32 %v2330_v41, %v2079_v39 }
 0x8e7   : > { %v2360_v43 = vsel %vm1780_vm0, %v2338_v42, -inf }
 0x8e8   : > { %2361 = vmax.xlane.f32.xlu0 %v2360_v43 }
 0x8f0   : > { %2391 = vadd.xlane.f32.xlu0 %v2390_v47 }
 0x8fa   : > { %3487 = vrot.lane.b32.xlu1 %v3481_v10, %s3703_s14 }
 0x933   : > { %v2347_v49 = vpop.xlane.xlu0 %2346 }
 0x934   : > { %v2365_v50 = vsub.f32 %v2333_v45, %v2347_v49 }
 0x936   : > { %v2375_v51 = vmul.f32 1.442695, %v2365_v50 }
 0x938   : > { %3581 = vpow2.f32 %v2375_v51 }
 0x93b   : > { %v2350_v53 = vpop.xlane.xlu2 %2349 }
 0x93c   : > { %v2366_v54 = vsub.f32 %v2334_v12, %v2350_v53 }
 0x93e   : > { %v4209_v55 = vpop.eup %3581  ;;  %v2377_v57 = vmul.f32 1.442695, %v2366_v54 }
 0x93f   : > { %v2393_v58 = vsel %vm1780_vm0, %v4209_v55, 0.0 }
 0x940   : > { %3583 = vpow2.f32 %v2377_v57  ;;  %2394 = vadd.xlane.f32.xlu0 %v2393_v58 }
 0x943   : > { %v2353_v59 = vpop.xlane.xlu1 %2352  ;;  %v3493_v24 = vpop.permute.xlu2 %3492 }
 0x944   : > { %v2367_v61 = vsub.f32 %v2335_v20, %v2353_v59  ;;  %v3495_v21 = vunpack.i.h.bf16 %v3493_v24  ;;  %v3494_v48 = vunpack.i.l.bf16 %v3493_v24 }
 0x946   : > { %v3584_v62 = vpop.eup %3583  ;;  %v2379_v63 = vmul.f32 1.442695, %v2367_v61 }
 0x947   : > { %v2396_v44 = vsel %vm1780_vm0, %v3584_v62, 0.0 }
 0x948   : > { %3585 = vpow2.f32 %v2379_v63  ;;  %2397 = vadd.xlane.f32.xlu2 %v2396_v44 }
 0x94b   : > { %v2356_v10 = vpop.xlane.xlu0 %2355 }
 0x94c   : > { %v2368_v3 = vsub.f32 %v2336_v26, %v2356_v10  ;;  %v2267_v26 = vpack.c.bf16 %v3495_v21, %v3494_v48 }
 0x94e   : > { %v3586_v4 = vpop.eup %3585  ;;  %v2381_v5 = vmul.f32 1.442695, %v2368_v3 }
 0x94f   : > { %v2399_v45 = vsel %vm1780_vm0, %v3586_v4, 0.0 }
 0x950   : > { %3587 = vpow2.f32 %v2381_v5  ;;  %2400 = vadd.xlane.f32.xlu1 %v2399_v45  ;;  %v3327_v45 = vld [vmem:[%s3943_s30] sm:$0xff] }
 0x953   : > { %v2389_v2 = vpop.xlane.xlu0 %2388 }
 0x954   : > { %v2359_v7 = vpop.xlane.xlu1 %2358 }
 0x955   : > { %v2369_v9 = vsub.f32 %v2337_v35, %v2359_v7 }
 0x956   : > { %v3588_v11 = vpop.eup %3587 }
 0x957   : > { %v2383_v12 = vmul.f32 1.442695, %v2369_v9  ;;  %v2402_v13 = vsel %vm1780_vm0, %v3588_v11, 0.0 }
 0x958   : > { %2403 = vadd.xlane.f32.xlu0 %v2402_v13 }
 0x959   : > { %3589 = vpow2.f32 %v2383_v12 }
 0x95b   : > { %v2362_v14 = vpop.xlane.xlu0 %2361 }
 0x95c   : > { %v2370_v15 = vsub.f32 %v2338_v42, %v2362_v14 }
 0x95e   : > { %v2385_v16 = vmul.f32 1.442695, %v2370_v15 }
 0x95f   : > { %v3590_v17 = vpop.eup %3589 }
 0x960   : > { %3591 = vpow2.f32 %v2385_v16  ;;  %v2405_v19 = vsel %vm1780_vm0, %v3590_v17, 0.0 }
 0x961   : > { %2406 = vadd.xlane.f32.xlu0 %v2405_v19 }
 0x963   : > { %v2392_v23 = vpop.xlane.xlu0 %2391 }
 0x964   : > { %3593 = vrcp.f32 %v2392_v23 }
 0x965   : > { %3595 = vrcp.f32 %v2389_v2 }
 0x966   : > { %v3592_v20 = vpop.eup %3591 }
 0x967   : > { %v2408_v22 = vsel %vm1780_vm0, %v3592_v20, 0.0 }
 0x969   : > { %2409 = vadd.xlane.f32.xlu0 %v2408_v22 }
 0x96a   : > { %v3594_v30 = vpop.eup %3593 }
 0x96b   : > { %v3596_v6 = vpop.eup %3595  ;;  %v2420_v31 = vmul.f32 %v3594_v30, %v3580_v46 }
 0x96c   : > { %v3488_v25 = vpop.permute.xlu1 %3487  ;;  %v2419_v32 = vmul.f32 %v3596_v6, %v4199_v34 }
 0x96d   : > { %v3490_v27 = vunpack.i.h.bf16 %v3488_v25  ;;  %v3489_v28 = vunpack.i.l.bf16 %v3488_v25 }
 0x96e   : > { %v2427_v33 = vpack.c.bf16 %v2420_v31, %v2419_v32  ;;  %v3330_v32 = vld [vmem:[%s3952_s28 + $0x8] sm:$0xff] }
 0x96f   : > { %v2268_v29 = vpack.c.bf16 %v3490_v27, %v3489_v28  ;;  %v3522_v27 = vld [vmem:[%s1382_s6] ss:$0 sm:$0xff]  ;;  %2655 = vmatpush.bf16.msra.mxu3 %v3330_v32 }
 0x971   : > { %2448 = vmatpush.bf16.msrb.mxu2 %v2268_v29 }
 0x975   : > { %2449 = vmatpush.bf16.msrb.mxu2 %v2267_v26 }
 0x979   : > { %2450 = vmatpush.bf16.msrb.mxu2 %v2266_v1 }
 0x97c   : > { %3258 = vmatmul.msk.bf16.vlgmr.msrb.gmra.mxu2 %vm1780_vm0, %v2427_v33 }
 0x9b3   : > { %v2395_v35 = vpop.xlane.xlu0 %2394 }
 0x9b4   : > { %3597 = vrcp.f32 %v2395_v35 }
 0x9ba   : > { %v3598_v36 = vpop.eup %3597 }
 0x9bb   : > { %v2398_v52 = vpop.xlane.xlu2 %2397  ;;  %v2421_v38 = vmul.f32 %v3598_v36, %v4209_v55 }
 0x9bc   : > { %3599 = vrcp.f32 %v2398_v52 }
 0x9c2   : > { %v3600_v37 = vpop.eup %3599 }
 0x9c3   : > { %v2422_v39 = vmul.f32 %v3600_v37, %v3584_v62  ;;  %v2401_v41 = vpop.xlane.xlu1 %2400  ;;  %v3328_v62 = vld [vmem:[%s3943_s30 + $0x8] sm:$0xff] }
 0x9c4   : > { %3601 = vrcp.f32 %v2401_v41  ;;  %2527 = vmatpush.bf16.msra.mxu0 %v3328_v62 }
 0x9c5   : > { %v2428_v40 = vpack.c.bf16 %v2422_v39, %v2421_v38 }
 0x9c7   : > { %3259 = vmatmul.msk.bf16.gmra.mxu2 %vm1780_vm0, %v2428_v40 }
 0x9c8   : > { %2528 = vmatpush.bf16.msra.mxu0 %v3327_v45 }
 0x9ca   : > { %v3602_v8 = vpop.eup %3601 }
 0x9cb   : > { %v2404_v34 = vpop.xlane.xlu0 %2403  ;;  %v2423_v1 = vmul.f32 %v3602_v8, %v3586_v4  ;;  %v3329_v8 = vld [vmem:[%s3952_s28] sm:$0xff] }
 0x9cc   : > { %3603 = vrcp.f32 %v2404_v34  ;;  %2656 = vmatpush.bf16.msra.mxu3 %v3329_v8 }
 0x9d2   : > { %v3604_v0 = vpop.eup %3603 }
 0x9d3   : > { %v2424_v42 = vmul.f32 %v3604_v0, %v3588_v11 }
 0x9d4   : > { %v2407_v43 = vpop.xlane.xlu0 %2406 }
 0x9d5   : > { %v2429_v46 = vpack.c.bf16 %v2424_v42, %v2423_v1  ;;  %3605 = vrcp.f32 %v2407_v43 }
 0x9d7   : > { %3260 = vmatmul.msk.bf16.gmra.mxu2 %vm1780_vm0, %v2429_v46 }
 0x9db   : > { %v3606_v49 = vpop.eup %3605 }
 0x9dc   : > { %v2410_v47 = vpop.xlane.xlu0 %2409  ;;  %v2425_v51 = vmul.f32 %v3606_v49, %v3590_v17 }
 0x9dd   : > { %3607 = vrcp.f32 %v2410_v47 }
 0x9e3   : > { %v3608_v50 = vpop.eup %3607 }
 0x9e4   : > { %v2426_v53 = vmul.f32 %v3608_v50, %v3592_v20 }
 0x9e6   : > { %v2430_v54 = vpack.c.bf16 %v2426_v53, %v2425_v51 }
 0x9e8   : > { %3261 = vmatmul.msk.bf16.gmra.mxu2 %vm1780_vm0, %v2430_v54 }
 0x9ff   : > { %v2452_v55 = vpop.f32.mrf.mxu2 }
 0xa07   : > { %v2454_v57 = vpop.f32.mrf.mxu2 }
 0xa4a   : > { %v2457_v58 = vpop.f32.mrf.mxu2 }
 0xa52   : > { %v2459_v59 = vpop.f32.mrf.mxu2 }
 0xa53   : > { %v3496_v61 = vpack.i.bf16 %v2459_v59, %v2457_v58 }
 0xa55   : > { %3497 = vrot.lane.b32.xlu0 %v3496_v61, %s3704_s7 }
 0xa5a   : > { %v2462_v63 = vpop.f32.mrf.mxu2 }
 0xa62   : > { %v2464_v44 = vpop.f32.mrf.mxu2 }
 0xa63   : > { %v3501_v10 = vpack.i.bf16 %v2464_v44, %v2462_v63 }
 0xa65   : > { %3502 = vrot.lane.b32.xlu2 %v3501_v10, %s3705_s10  ;;  %v3334_v10 = vld [vmem:[%s3958_s9 + $0x18] sm:$0xff] }
 0xa66   : > { %2705 = vmatpush.bf16.msrb.mxu0 %v3334_v10 }
 0xa6b   : > { %v2467_v3 = vpop.f32.mrf.mxu2 }
 0xa73   : > { %v2469_v4 = vpop.f32.mrf.mxu2 }
 0xa74   : > { %v3506_v5 = vpack.i.bf16 %v2469_v4, %v2467_v3 }
 0xa76   : > { %3507 = vrot.lane.b32.xlu1 %v3506_v5, %s3706_s15 }
 0xabf   : > { %v3503_v11 = vpop.permute.xlu2 %3502 }
 0xac0   : > { %v3505_v14 = vunpack.i.h.bf16 %v3503_v11  ;;  %v3504_v15 = vunpack.i.l.bf16 %v3503_v11 }
 0xac7   : > { %v3498_v2 = vpop.permute.xlu0 %3497 }
 0xac8   : > { %v3500_v7 = vunpack.i.h.bf16 %v3498_v2  ;;  %v3499_v9 = vunpack.i.l.bf16 %v3498_v2 }
 0xaca   : > { %v2497_v12 = vsel %vm1710_vm15, %v2454_v57, %v3500_v7  ;;  %v2496_v13 = vsel %vm1710_vm15, %v2452_v55, %v3499_v9 }
 0xacb   : > { %v2498_v20 = vsel %vm1940_vm2, %v2496_v13, %v3504_v15  ;;  %v2499_v22 = vsel %vm1940_vm2, %v2497_v12, %v3505_v14 }
 0xae8   : > { %v3508_v16 = vpop.permute.xlu1 %3507 }
 0xae9   : > { %v3510_v17 = vunpack.i.h.bf16 %v3508_v16  ;;  %v3509_v19 = vunpack.i.l.bf16 %v3508_v16 }
 0xaeb   : > { %v2500_v23 = vsel %vm1943_vm3, %v2498_v20, %v3509_v19  ;;  %v2501_v24 = vsel %vm1943_vm3, %v2499_v22, %v3510_v17 }
 0xaec   : > { %v2502_v25 = vpack.c.bf16 %v2501_v24, %v2500_v23 }
 0xaee   : > { %3270 = vmatmul.msk.bf16.vlgmr.msra.gmra.mxu0 %vm1425_vm1, %v2502_v25 }
 0xb6b   : > { %v2530_v28 = vpop.f32.mrf.mxu0 }
 0xb6c   : > { %v2531_v21 = vadd.f32 %v3522_v27, %v2530_v28 }
 0xb6e   : > { %v4243_v48 = vadd.f32 %v2531_v21, %v4108_v56 }
 0xb70   : > { %v2539_v29 = vsel %vm1425_vm1, %v4243_v48, 0.0 }
 0xb71   : > { %2540 = vadd.xlane.f32.xlu0 %v2539_v29  ;;  %v3523_v29 = vld [vmem:[%s1385_s5] ss:$0 sm:$0xff] }
 0xb73   : > { %v2532_v30 = vpop.f32.mrf.mxu0 }
 0xb74   : > { %v2533_v26 = vadd.f32 %v3522_v27, %v2532_v30 }
 0xb76   : > { %v4248_v6 = vadd.f32 %v2533_v26, %v4113_v60 }
 0xb78   : > { %v2542_v31 = vsel %vm1425_vm1, %v4248_v6, 0.0 }
 0xb79   : > { %2543 = vadd.xlane.f32.xlu2 %v2542_v31 }
 0xbe4   : > { %v2541_v33 = vpop.xlane.xlu0 %2540 }
 0xbe5   : > { %v2545_v56 = vmul.f32 %v2541_v33, %v3975_v18 }
 0xbe7   : > { %v4255_v35 = vsub.f32 %v4243_v48, %v2545_v56  ;;  %v3524_v56 = vld [vmem:[%s1388_s12] ss:$0 sm:$0xff] }
 0xbe9   : > { %v2549_v52 = vmul.f32 %v4255_v35, %v4255_v35 }
 0xbeb   : > { %v2551_v36 = vsel %vm1425_vm1, %v2549_v52, 0.0 }
 0xbec   : > { %v2544_v60 = vpop.xlane.xlu2 %2543  ;;  %2552 = vadd.xlane.f32.xlu1 %v2551_v36 }
 0xbed   : > { %v2546_v37 = vmul.f32 %v2544_v60, %v3975_v18 }
 0xbef   : > { %v4262_v38 = vsub.f32 %v4248_v6, %v2546_v37  ;;  %v3333_v37 = vld [vmem:[%s3958_s9 + $0x10] sm:$0xff] }
 0xbf0   : > { %2706 = vmatpush.bf16.msrb.mxu0 %v3333_v37 }
 0xbf1   : > { %v2550_v39 = vmul.f32 %v4262_v38, %v4262_v38 }
 0xbf3   : > { %v2554_v40 = vsel %vm1425_vm1, %v2550_v39, 0.0  ;;  %v3332_v39 = vld [vmem:[%s3958_s9 + $0x8] sm:$0xff] }
 0xbf4   : > { %2555 = vadd.xlane.f32.xlu0 %v2554_v40  ;;  %2707 = vmatpush.bf16.msrb.mxu0 %v3332_v39  ;;  %v3331_v40 = vld [vmem:[%s3958_s9] sm:$0xff]  ;;  %s4434_s9 = sld [smem:[#allocation40_spill]] }
 0xbf8   : > { %2708 = vmatpush.bf16.msrb.mxu0 %v3331_v40 }
 0xbfa   : > { %p3297_p5 = scmp.ne.s32.totalorder %s4434_s9, 1 }
 0xbfb   : > { %s4436_s12 = sld [smem:[#allocation37_spill]] (!%p3297_p5) }
 0xc5f   : > { %v2553_v41 = vpop.xlane.xlu1 %2552 }
 0xc60   : > { %v2557_v34 = vmul.f32 0.032258064, %v2553_v41 }
 0xc62   : > { %3609 = vrsqrt.f32 %v2557_v34  ;;  %vm2566_vm15 = vcmp.eq.f32.partialorder %v2557_v34, inf  ;;  %v2569_v57 = vand.u32 2147483648, %v2557_v34  ;;  %vm2568_vm2 = vcmp.eq.f32.partialorder %v2557_v34, 0.0 }
 0xc67   : > { %v2556_v0 = vpop.xlane.xlu0 %2555 }
 0xc68   : > { %v3610_v1 = vpop.eup %3609  ;;  %v2558_v42 = vmul.f32 0.032258064, %v2556_v0 }
 0xc69   : > { %v2560_v43 = vmul.f32 %v3610_v1, %v2557_v34 }
 0xc6a   : > { %3611 = vrsqrt.f32 %v2558_v42  ;;  %vm2578_vm3 = vcmp.eq.f32.partialorder %v2558_v42, inf  ;;  %v2581_v4 = vand.u32 2147483648, %v2558_v42  ;;  %vm2580_vm5 = vcmp.eq.f32.partialorder %v2558_v42, 0.0 }
 0xc6b   : > { %v2561_v46 = vmul.f32 %v3610_v1, %v2560_v43 }
 0xc6d   : > { %v2562_v47 = vmul.f32 0.5, %v2561_v46  ;;  %v3526_v46 = vld [vmem:[%s1404_s4] ss:$0 sm:$0xff] }
 0xc6f   : > { %v2563_v49 = vsub.f32 1.5, %v2562_v47 }
 0xc70   : > { %v3612_v50 = vpop.eup %3611 }
 0xc71   : > { %v2564_v51 = vmul.f32 %v3610_v1, %v2563_v49  ;;  %v2572_v53 = vmul.f32 %v3612_v50, %v2558_v42 }
 0xc73   : > { %v2565_v54 = vmul.f32 %v2564_v51, %v2557_v34  ;;  %v2573_v55 = vmul.f32 %v3612_v50, %v2572_v53 }
 0xc75   : > { %v2567_v58 = vsel %vm2566_vm15, %v2557_v34, %v2565_v54  ;;  %v2574_v59 = vmul.f32 0.5, %v2573_v55 }
 0xc76   : > { %v2570_v61 = vsel %vm2568_vm2, %v2569_v57, %v2567_v58 }
 0xc77   : > { %v2583_v62 = vadd.f32 1e-06, %v2570_v61  ;;  %v2575_v63 = vsub.f32 1.5, %v2574_v59 }
 0xc79   : > { %3613 = vrcp.f32 %v2583_v62  ;;  %v2576_v44 = vmul.f32 %v3612_v50, %v2575_v63  ;;  %v2596_v13 = vand.u32 2147483648, %v2583_v62  ;;  %vm2590_vm7 = vweird.f32 %v2583_v62 }
 0xc7a   : > { %v2594_v15 = vand.u32 2147483647, %v2583_v62 }
 0xc7b   : > { %v2577_v3 = vmul.f32 %v2576_v44, %v2558_v42  ;;  %v2597_v20 = vor.u32 1.1754944e-38, %v2596_v13 }
 0xc7c   : > { %vm2595_vm9 = vcmp.eq.f32.partialorder %v2594_v15, 8.507059e+37 }
 0xc7d   : > { %v2579_v5 = vsel %vm2578_vm3, %v2558_v42, %v2577_v3 }
 0xc7e   : > { %v2582_v45 = vsel %vm2580_vm5, %v2581_v4, %v2579_v5 }
 0xc7f   : > { %v3614_v2 = vpop.eup %3613  ;;  %v2584_v7 = vadd.f32 1e-06, %v2582_v45 }
 0xc80   : > { %v2586_v9 = vmul.f32 %v3614_v2, %v2583_v62  ;;  %vm2591_vm6 = vweird.f32 %v3614_v2 }
 0xc81   : > { %3615 = vrcp.f32 %v2584_v7  ;;  %vm2592_vm8 = vmor %vm2590_vm7, %vm2591_vm6  ;;  %v2610_v24 = vand.u32 2147483648, %v2584_v7  ;;  %v2608_v27 = vand.u32 2147483647, %v2584_v7  ;;  %vm2604_vm11 = vweird.f32 %v2584_v7 }
 0xc82   : > { %v2587_v11 = vsub.f32 1.0, %v2586_v9 }
 0xc83   : > { %v2611_v30 = vor.u32 1.1754944e-38, %v2610_v24  ;;  %vm2609_vm13 = vcmp.eq.f32.partialorder %v2608_v27, 8.507059e+37 }
 0xc84   : > { %v2588_v12 = vmul.f32 %v3614_v2, %v2587_v11 }
 0xc86   : > { %v2589_v14 = vadd.f32 %v3614_v2, %v2588_v12 }
 0xc87   : > { %v3616_v16 = vpop.eup %3615 }
 0xc88   : > { %v2593_v17 = vsel %vm2592_vm8, %v3614_v2, %v2589_v14  ;;  %v2600_v19 = vmul.f32 %v3616_v16, %v2584_v7  ;;  %vm2605_vm10 = vweird.f32 %v3616_v16 }
 0xc89   : > { %v2598_v23 = vsel %vm2595_vm9, %v2597_v20, %v2593_v17  ;;  %vm2606_vm12 = vmor %vm2604_vm11, %vm2605_vm10 }
 0xc8a   : > { %v2601_v22 = vsub.f32 1.0, %v2600_v19  ;;  %v2613_v21 = vmul.f32 %v2598_v23, %v4255_v35 }
 0xc8c   : > { %v2602_v25 = vmul.f32 %v3616_v16, %v2601_v22  ;;  %v2618_v33 = vmul.f32 %v3523_v29, %v2613_v21 }
 0xc8e   : > { %v2603_v28 = vadd.f32 %v3616_v16, %v2602_v25  ;;  %v2623_v36 = vadd.f32 %v3524_v56, %v2618_v33 }
 0xc90   : > { %v2607_v26 = vsel %vm2606_vm12, %v3616_v16, %v2603_v28 }
 0xc91   : > { %v2612_v31 = vsel %vm2609_vm13, %v2611_v30, %v2607_v26 }
 0xc92   : > { %v2614_v32 = vmul.f32 %v2612_v31, %v4262_v38  ;;  %v3525_v38 = vld [vmem:[%s1396_s8] ss:$0 sm:$0xff]  ;;  %s4435_s8 = sld [smem:[#allocation36_spill]] (!%p3297_p5) }
 0xc94   : > { %v2619_v52 = vmul.f32 %v3523_v29, %v2614_v32 }
 0xc96   : > { %v2624_v60 = vadd.f32 %v3524_v56, %v2619_v52 }
 0xc98   : > { %v2625_v35 = vpack.c.bf16 %v2624_v60, %v2623_v36 }
 0xc9a   : > { %3279 = vmatmul.msk.bf16.vlgmr.msra.gmra.mxu3 %vm1425_vm1, %v2625_v35 }
 0xd1d   : > { %v2658_v41 = vpop.f32.mrf.mxu3 }
 0xd1e   : > { %v2659_v34 = vadd.f32 %v3525_v38, %v2658_v41 }
 0xd20   : > { %v2663_v1 = vmax.f32 %v2659_v34, 0.0 }
 0xd25   : > { %v2660_v8 = vpop.f32.mrf.mxu3 }
 0xd26   : > { %v2661_v0 = vadd.f32 %v3525_v38, %v2660_v8 }
 0xd28   : > { %v2664_v42 = vmax.f32 %v2661_v0, 0.0 }
 0xd2a   : > { %v2665_v43 = vpack.c.bf16 %v2664_v42, %v2663_v1 }
 0xd2c   : > { %3296 = vmatmul.msk.bf16.vlgmr.msrb.gmra.mxu0 %vm1780_vm0, %v2665_v43 }
 0xda9   : > { %v2710_v47 = vpop.f32.mrf.mxu0 }
 0xdaa   : > { %v2715_v49 = vadd.f32 %v2710_v47, %v4243_v48 }
 0xdac   : > { %v2721_v50 = vadd.f32 %v3526_v46, %v2715_v49 }
 0xdae   : > { %2723 = vst.msk [vmem:[#allocation2] sm:$0xff] %vm1425_vm1, %v2721_v50 }
 0xdb1   : > { %v2712_v51 = vpop.f32.mrf.mxu0 }
 0xdb2   : > { %v2716_v53 = vadd.f32 %v2712_v51, %v4248_v6  ;;  %2728 = sbr.rel (%p3297_p5) target bundleno = 3808 (0xee0), region = 160 }
 0xdb4   : > { %v2722_v54 = vadd.f32 %v3526_v46, %v2716_v53 }
 0xdb6   : > { %2724 = vst.msk [vmem:[#allocation2 + $0x8] sm:$0xff] %vm1425_vm1, %v2722_v54 }
 0xdb7   : > { %v2731_v55 = vsel %vm1425_vm1, %v2721_v50, 0.0  ;;  %v2734_v57 = vsel %vm1425_vm1, %v2722_v54, 0.0  ;;  %v3617_v40 = vld [vmem:[%s4435_s8] ss:$0 sm:$0xff] }
 0xdb8   : > { %2732 = vadd.xlane.f32.xlu0 %v2731_v55  ;;  %v3618_v8 = vld [vmem:[%s4436_s12] ss:$0 sm:$0xff] }
 0xdc0   : > { %2735 = vadd.xlane.f32.xlu0 %v2734_v57 }
 0xe2b   : > { %v2733_v58 = vpop.xlane.xlu0 %2732 }
 0xe2c   : > { %v2737_v48 = vmul.f32 %v2733_v58, %v3975_v18 }
 0xe2e   : > { %v2739_v59 = vsub.f32 %v2721_v50, %v2737_v48 }
 0xe30   : > { %v2741_v61 = vmul.f32 %v2739_v59, %v2739_v59 }
 0xe32   : > { %v2743_v62 = vsel %vm1425_vm1, %v2741_v61, 0.0 }
 0xe33   : > { %2744 = vadd.xlane.f32.xlu1 %v2743_v62  ;;  %v2736_v6 = vpop.xlane.xlu0 %2735 }
 0xe34   : > { %v2738_v63 = vmul.f32 %v2736_v6, %v3975_v18 }
 0xe36   : > { %v4298_v44 = vsub.f32 %v2722_v54, %v2738_v63 }
 0xe38   : > { %v2742_v10 = vmul.f32 %v4298_v44, %v4298_v44 }
 0xe3a   : > { %v2746_v3 = vsel %vm1425_vm1, %v2742_v10, 0.0 }
 0xe3b   : > { %2747 = vadd.xlane.f32.xlu1 %v2746_v3 }
 0xea6   : > { %v2745_v4 = vpop.xlane.xlu1 %2744 }
 0xea7   : > { %v2749_v5 = vmul.f32 0.032258064, %v2745_v4 }
 0xea9   : > { %3619 = vrsqrt.f32 %v2749_v5  ;;  %vm2758_vm0 = vcmp.eq.f32.partialorder %v2749_v5, inf  ;;  %v2761_v19 = vand.u32 2147483648, %v2749_v5  ;;  %vm2760_vm14 = vcmp.eq.f32.partialorder %v2749_v5, 0.0 }
 0xeae   : > { %v2748_v45 = vpop.xlane.xlu1 %2747 }
 0xeaf   : > { %v3620_v2 = vpop.eup %3619  ;;  %v2750_v7 = vmul.f32 0.032258064, %v2748_v45 }
 0xeb0   : > { %v2752_v9 = vmul.f32 %v3620_v2, %v2749_v5 }
 0xeb1   : > { %3621 = vrsqrt.f32 %v2750_v7  ;;  %vm2770_vm4 = vcmp.eq.f32.partialorder %v2750_v7, inf  ;;  %v2773_v21 = vand.u32 2147483648, %v2750_v7  ;;  %vm2772_vm15 = vcmp.eq.f32.partialorder %v2750_v7, 0.0 }
 0xeb2   : > { %v2753_v11 = vmul.f32 %v3620_v2, %v2752_v9 }
 0xeb4   : > { %v2754_v12 = vmul.f32 0.5, %v2753_v11 }
 0xeb6   : > { %v2755_v13 = vsub.f32 1.5, %v2754_v12 }
 0xeb7   : > { %v3622_v18 = vpop.eup %3621 }
 0xeb8   : > { %v2756_v14 = vmul.f32 %v3620_v2, %v2755_v13  ;;  %v2764_v15 = vmul.f32 %v3622_v18, %v2750_v7 }
 0xeba   : > { %v2757_v16 = vmul.f32 %v2756_v14, %v2749_v5  ;;  %v2765_v17 = vmul.f32 %v3622_v18, %v2764_v15 }
 0xebc   : > { %v2759_v20 = vsel %vm2758_vm0, %v2749_v5, %v2757_v16  ;;  %v2766_v22 = vmul.f32 0.5, %v2765_v17 }
 0xebd   : > { %v2762_v23 = vsel %vm2760_vm14, %v2761_v19, %v2759_v20 }
 0xebe   : > { %v2775_v24 = vadd.f32 1e-06, %v2762_v23  ;;  %v2767_v25 = vsub.f32 1.5, %v2766_v22 }
 0xec0   : > { %3623 = vrcp.f32 %v2775_v24  ;;  %v2768_v27 = vmul.f32 %v3622_v18, %v2767_v25  ;;  %v2788_v56 = vand.u32 2147483648, %v2775_v24  ;;  %v2786_v36 = vand.u32 2147483647, %v2775_v24 }
 0xec1   : > { %vm2782_vm3 = vweird.f32 %v2775_v24 }
 0xec2   : > { %v2769_v28 = vmul.f32 %v2768_v27, %v2750_v7  ;;  %v2789_v35 = vor.u32 1.1754944e-38, %v2788_v56  ;;  %vm2787_vm6 = vcmp.eq.f32.partialorder %v2786_v36, 8.507059e+37 }
 0xec4   : > { %v2771_v29 = vsel %vm2770_vm4, %v2750_v7, %v2769_v28 }
 0xec5   : > { %v2774_v26 = vsel %vm2772_vm15, %v2773_v21, %v2771_v29 }
 0xec6   : > { %v3624_v30 = vpop.eup %3623  ;;  %v2776_v32 = vadd.f32 1e-06, %v2774_v26 }
 0xec7   : > { %v2778_v31 = vmul.f32 %v3624_v30, %v2775_v24  ;;  %vm2783_vm2 = vweird.f32 %v3624_v30 }
 0xec8   : > { %3625 = vrcp.f32 %v2776_v32  ;;  %vm2784_vm5 = vmor %vm2782_vm3, %vm2783_vm2  ;;  %v2802_v42 = vand.u32 2147483648, %v2776_v32  ;;  %v2800_v46 = vand.u32 2147483647, %v2776_v32  ;;  %vm2796_vm8 = vweird.f32 %v2776_v32 }
 0xec9   : > { %v2779_v33 = vsub.f32 1.0, %v2778_v31 }
 0xeca   : > { %v2803_v50 = vor.u32 1.1754944e-38, %v2802_v42  ;;  %vm2801_vm10 = vcmp.eq.f32.partialorder %v2800_v46, 8.507059e+37 }
 0xecb   : > { %v2780_v52 = vmul.f32 %v3624_v30, %v2779_v33 }
 0xecd   : > { %v2781_v60 = vadd.f32 %v3624_v30, %v2780_v52 }
 0xece   : > { %v3626_v37 = vpop.eup %3625 }
 0xecf   : > { %v2785_v39 = vsel %vm2784_vm5, %v3624_v30, %v2781_v60  ;;  %v2792_v38 = vmul.f32 %v3626_v37, %v2776_v32  ;;  %vm2797_vm7 = vweird.f32 %v3626_v37 }
 0xed0   : > { %v2790_v41 = vsel %vm2787_vm6, %v2789_v35, %v2785_v39  ;;  %vm2798_vm9 = vmor %vm2796_vm8, %vm2797_vm7 }
 0xed1   : > { %v2805_v34 = vmul.f32 %v2790_v41, %v2739_v59  ;;  %v2793_v0 = vsub.f32 1.0, %v2792_v38 }
 0xed3   : > { %v2810_v1 = vmul.f32 %v3617_v40, %v2805_v34  ;;  %v2794_v43 = vmul.f32 %v3626_v37, %v2793_v0 }
 0xed5   : > { %v2815_v47 = vadd.f32 %v3618_v8, %v2810_v1  ;;  %v2795_v49 = vadd.f32 %v3626_v37, %v2794_v43 }
 0xed7   : > { %2817 = vst.msk [vmem:[#allocation3] sm:$0xff] %vm1425_vm1, %v2815_v47  ;;  %v2799_v51 = vsel %vm2798_vm9, %v3626_v37, %v2795_v49 }
 0xed8   : > { %v2804_v53 = vsel %vm2801_vm10, %v2803_v50, %v2799_v51 }
 0xed9   : > { %v2806_v54 = vmul.f32 %v2804_v53, %v4298_v44 }
 0xedb   : > { %v2811_v55 = vmul.f32 %v3617_v40, %v2806_v54 }
 0xedd   : > { %v2816_v57 = vadd.f32 %v3618_v8, %v2811_v55 }
 0xedf   : > { %2818 = vst.msk [vmem:[#allocation3 + $0x8] sm:$0xff] %vm1425_vm1, %v2816_v57 }
 0xee0 PF: > { %s4437_s4 = sld [smem:[#allocation40_spill]]  ;;  %s3707_s28 = smov [#allocation3]  }
 0xee1   : > { %s4438_s0 = sld [smem:[#allocation38_spill]]  ;;  %s2824_s13 = sshll.u32 %s3707_s28, 4  ;;  %s2825_s13 = int_to_ptr.vmem [resolvable:$true] %s2824_s13 }
 0xee6   : > { %p3339_p6 = scmp.eq.s32.totalorder %s4437_s4, 1 }
 0xee7   : > { %s2826_s3 = sshll.u32 %s4438_s0, 4  ;;  %s3647_s15 = scalar_lea.hbm %s4438_s0, 16  ;;  %s2827_s3 = int_to_ptr.hbm [resolvable:$true] %s2826_s3 }
 0xee8   : > { %s3641_s14 = sshra.s32 %s2827_s3, 4  ;;  %s3642_s14 = int_to_ptr.hbm [resolvable:$true] %s3641_s14 }
 0xee9   : > { %s3643_s10 = scalar_lea.hbm %s3642_s14, 16  ;;  %p3648_p10 = scmp.lt.s32.totalorder %s3642_s14, %s4438_s0 }
 0xeea   : > { %p3644_p7 = scmp.ne.s32.totalorder %s3642_s14, %s3643_s10  ;;  %p3649_p11 = scmp.lt.s32.totalorder %s3647_s15, %s3643_s10 }
 0xeec   : > { %p3645_p8 = pnand %p3644_p7, %p3339_p6  ;;  %p3650_p12 = por %p3649_p11, %p3648_p10 }
 0xeee   : > { %p3646_p9 = pneg %p3645_p8 }
 0xef0   : > { %p3651_p13 = pnand %p3650_p12, %p3646_p9 }
 0xef2   : > { %3654 = shalt.err (!%p3651_p13)
}
 0xef3   : > { %s3708_s18 = smov 128  }
 0xef4   : > { %3336 = dma.vmem_to_hbm [thread:$0]  (%p3339_p6), %s2825_s13, 256, %s2827_s3, [#allocation4], %s3708_s18, %s3708_s18, %s3704_s7  }
 0xef5   : > { %3660 = dma.done.wait (%p3339_p6), [#allocation4], 256  }
 0xef6   : > { %3662 = vsyncadd (%p3339_p6), [#allocation4], 4294967040 }
 0xef7 PF: > { %s4439_s22 = sld [smem:[#allocation39_spill]] }
 0xefd   : > { %s78_s7 = sadd.s32 1, %s4439_s22  }
 0xefe   : > { %p75_p0 = scmp.ge.s32.totalorder %s78_s7, 4  }
 0xf00   :  { %77 = sbr.rel (!%p75_p0) target bundleno = 78 (0x4e), region = 295 }
 0xf05   :  { %2843 = vsyncpa [#allocation4], 1 }
 0xf06   :  { %2845 = vsyncpa [#allocation4 + $0x1], 1 }

</bundles_post_ra>
